<compile_context>
chip_gen: v6e
topology: v6e:2x2x1
jax: 0.10.0
libtpu: 0.0.40
codegen_flags: <defaults>
</compile_context>

<pallas_src>
import jax
import jax.numpy as jnp
from jax.experimental import pallas as pl
from jax.experimental.pallas import tpu as pltpu


def cnet_kernel(s_ref, a_ref,
                w1s_ref, w1a_ref, b1_ref,
                w2_ref, b2_ref,
                w3_ref, b3_ref,
                w4_ref, b4_ref,
                out_ref):
    # Layer 1: split matmul replaces cat(s, a) @ W1.
    h1 = jnp.dot(s_ref[...], w1s_ref[...], preferred_element_type=jnp.float32)
    h1 = h1 + jnp.dot(a_ref[...], w1a_ref[...],
                      preferred_element_type=jnp.float32)
    h1 = jnp.maximum(h1 + b1_ref[...], 0.0)                        # [TB,128] f32

    # Layers 2-3 on the MXU (inputs may be bf16, accumulate f32).
    h2 = jnp.maximum(
        jnp.dot(h1.astype(w2_ref.dtype), w2_ref[...],
                preferred_element_type=jnp.float32) + b2_ref[...], 0.0)  # [TB,256]
    h3 = jnp.maximum(
        jnp.dot(h2.astype(w3_ref.dtype), w3_ref[...],
                preferred_element_type=jnp.float32) + b3_ref[...], 0.0)  # [TB,128]

    # Layer 4 (128 -> 1): VPU multiply + sublane reduce; MXU stays free and the
    # store is a lane-dense [1, TB] row instead of a masked [TB, 1] column.
    h3t = h3.T                                                     # [128,TB] XLU
    q = jnp.sum(h3t * w4_ref[...].astype(jnp.float32), axis=0, keepdims=True)
    out_ref[...] = (q + b4_ref[...]).astype(out_ref.dtype)         # [1, TB]


def cnet_forward(s, a, params, *, block_b=256, compute_dtype=jnp.float32):
    """s: [B, s_dim], a: [B, a_dim]  ->  q-values [B, 1] (float32).

    block_b: batch tile (multiple of 128; 256+ fills the v6e/v7x MXU, and the
    double-buffered activations stay far under v7x's 64 MiB VMEM).
    compute_dtype: matmul-input dtype; use jnp.bfloat16 on v6e/v7x for MXU peak
    (accumulation, bias-add and ReLU remain f32 either way).
    """
    B, s_dim = s.shape
    a_dim = a.shape[1]

    (w1, b1), (w2, b2), (w3, b3), (w4, b4) = params
    w1s, w1a = w1[:s_dim], w1[s_dim:]        # split first-layer weight
    b4 = b4.reshape(1, 1)                    # scalar bias as a (1,1) VMEM tile

    num_tiles = pl.cdiv(B, block_b)
    b_pad = num_tiles * block_b
    if b_pad != B:
        s = jnp.pad(s, ((0, b_pad - B), (0, 0)))
        a = jnp.pad(a, ((0, b_pad - B), (0, 0)))

    s = s.astype(compute_dtype)
    a = a.astype(compute_dtype)
    w1s, w1a, w2, w3 = (w.astype(compute_dtype) for w in (w1s, w1a, w2, w3))
    b1, b2, b3, b4, w4 = (x.astype(jnp.float32) for x in (b1, b2, b3, b4, w4))

    operands = (s, a, w1s, w1a, b1, w2, b2, w3, b3, w4, b4)

    def act_spec(arr):        # batch-tiled activations, pipelined over the grid
        return pl.BlockSpec((block_b, arr.shape[1]), lambda i: (i, 0))

    def resident_spec(arr):   # weights/biases: constant block -> stay in VMEM
        return pl.BlockSpec(arr.shape, lambda i: (0, 0))

    in_specs = ([act_spec(s), act_spec(a)]
                + [resident_spec(x) for x in operands[2:]])

    flops = 2 * b_pad * ((s_dim + a_dim) * 128 + 128 * 256 + 256 * 128 + 128)
    bytes_accessed = (sum(int(x.size) * x.dtype.itemsize for x in operands)
                      + b_pad * 4)

    q_row = pl.pallas_call(
        cnet_kernel,
        out_shape=jax.ShapeDtypeStruct((1, b_pad), jnp.float32),
        grid=(num_tiles,),
        in_specs=in_specs,
        out_specs=pl.BlockSpec((1, block_b), lambda i: (0, i)),
        compiler_params=pltpu.CompilerParams(
            dimension_semantics=("parallel",)),     # v7x: shard batch over 2 TCs
        cost_estimate=pl.CostEstimate(
            flops=flops, transcendentals=0, bytes_accessed=bytes_accessed),
    )(*operands)

    return q_row[0, :B].reshape(B, 1)


def init_linear_params(key, in_features, out_features):
    """torch.nn.Linear-style init (uniform +/- 1/sqrt(fan_in)).
    Weight is stored transposed: [in_features, out_features]."""
    kw, kb = jax.random.split(key)
    bound = 1.0 / jnp.sqrt(jnp.float32(in_features))
    w = jax.random.uniform(kw, (in_features, out_features), jnp.float32,
                           minval=-bound, maxval=bound)
    b = jax.random.uniform(kb, (1, out_features), jnp.float32,
                           minval=-bound, maxval=bound)
    return w, b


def init_cnet_params(key, s_dim, a_dim):
    keys = jax.random.split(key, 4)
    return (
        init_linear_params(keys[0], s_dim + a_dim, 128),  # fcs
        init_linear_params(keys[1], 128, 256),            # fc2
        init_linear_params(keys[2], 256, 128),            # fc7
        init_linear_params(keys[3], 128, 1),              # out
    )


if __name__ == "__main__":
    key = jax.random.PRNGKey(0)
    k_s, k_a, k_p = jax.random.split(key, 3)

    B, S_DIM, A_DIM = 8, 12, 4
    s = jax.random.normal(k_s, (B, S_DIM), jnp.float32)
    a = jax.random.normal(k_a, (B, A_DIM), jnp.float32)
    params = init_cnet_params(k_p, S_DIM, A_DIM)

    # Pure-JAX reference.
    def ref(s, a, params):
        x = jnp.concatenate((s, a), axis=-1).astype(jnp.float32)
        (w1, b1), (w2, b2), (w3, b3), (w4, b4) = params
        x = jnp.maximum(x @ w1 + b1, 0.0)
        x = jnp.maximum(x @ w2 + b2, 0.0)
        x = jnp.maximum(x @ w3 + b3, 0.0)
        return x @ w4 + b4

    q_ref = ref(s, a, params)

    # f32 path (exact semantics of the PyTorch module).
    q = cnet_forward(s, a, params)
    jax.block_until_ready(q)
    assert q.shape == (B, 1)
    assert jnp.allclose(q, q_ref, atol=1e-4, rtol=1e-4)

    # bf16 matmul-input path (v6e/v7x MXU-peak option), f32 accumulation.
    q_bf16 = cnet_forward(s, a, params, compute_dtype=jnp.bfloat16)
    jax.block_until_ready(q_bf16)
    assert q_bf16.shape == (B, 1)
    assert bool(jnp.all(jnp.isfinite(q_bf16)))
    assert jnp.allclose(q_bf16, q_ref, atol=1e-1, rtol=1e-1)

    print("KERNEL_OK")
</pallas_src>

<mosaic_0001>
module attributes {stable_mosaic.version = 11 : i64} {
  func.func @cnet_kernel(%arg0: i32, %arg1: memref<256x12xf32, #tpu.memory_space<vmem>>, %arg2: memref<256x4xf32, #tpu.memory_space<vmem>>, %arg3: memref<12x128xf32, #tpu.memory_space<vmem>>, %arg4: memref<4x128xf32, #tpu.memory_space<vmem>>, %arg5: memref<1x128xf32, #tpu.memory_space<vmem>>, %arg6: memref<128x256xf32, #tpu.memory_space<vmem>>, %arg7: memref<1x256xf32, #tpu.memory_space<vmem>>, %arg8: memref<256x128xf32, #tpu.memory_space<vmem>>, %arg9: memref<1x128xf32, #tpu.memory_space<vmem>>, %arg10: memref<128x1xf32, #tpu.memory_space<vmem>>, %arg11: memref<1x1xf32, #tpu.memory_space<vmem>>, %arg12: memref<1x256xf32, #tpu.memory_space<vmem>>) attributes {dimension_semantics = [#tpu.dimension_semantics<parallel>], iteration_bounds = array<i64: 1>, scalar_prefetch = 0 : i64, scratch_operands = 0 : i64, tpu.core_type = #tpu.core_type<tc>, window_params = [{transform_indices = @transform_0, window_bounds = array<i64: 256, 12>}, {transform_indices = @transform_1, window_bounds = array<i64: 256, 4>}, {pipeline_mode = #tpu.pipeline_mode<synchronous>, transform_indices = @transform_2, window_bounds = array<i64: 12, 128>}, {pipeline_mode = #tpu.pipeline_mode<synchronous>, transform_indices = @transform_3, window_bounds = array<i64: 4, 128>}, {pipeline_mode = #tpu.pipeline_mode<synchronous>, transform_indices = @transform_4, window_bounds = array<i64: 1, 128>}, {pipeline_mode = #tpu.pipeline_mode<synchronous>, transform_indices = @transform_5, window_bounds = array<i64: 128, 256>}, {pipeline_mode = #tpu.pipeline_mode<synchronous>, transform_indices = @transform_6, window_bounds = array<i64: 1, 256>}, {pipeline_mode = #tpu.pipeline_mode<synchronous>, transform_indices = @transform_7, window_bounds = array<i64: 256, 128>}, {pipeline_mode = #tpu.pipeline_mode<synchronous>, transform_indices = @transform_8, window_bounds = array<i64: 1, 128>}, {pipeline_mode = #tpu.pipeline_mode<synchronous>, transform_indices = @transform_9, window_bounds = array<i64: 128, 1>}, {pipeline_mode = #tpu.pipeline_mode<synchronous>, transform_indices = @transform_10, window_bounds = array<i64: 1, 1>}, {transform_indices = @transform_11, window_bounds = array<i64: 1, 256>}]} {
    %c0 = arith.constant 0 : index
    %c0_0 = arith.constant 0 : index
    %0 = vector.load %arg1[%c0, %c0_0] : memref<256x12xf32, #tpu.memory_space<vmem>>, vector<256x12xf32>
    %c0_1 = arith.constant 0 : index
    %c0_2 = arith.constant 0 : index
    %1 = vector.load %arg3[%c0_1, %c0_2] : memref<12x128xf32, #tpu.memory_space<vmem>>, vector<12x128xf32>
    %cst = arith.constant dense<0.000000e+00> : vector<256x128xf32>
    %2 = tpu.matmul %0, %1, %cst {dimension_numbers = #tpu.dot_dimension_numbers<[1], [0], [0], [1], [0, 0, 1, 1], [], []>} : vector<256x12xf32>, vector<12x128xf32>, vector<256x128xf32> -> vector<256x128xf32>
    %c0_3 = arith.constant 0 : index
    %c0_4 = arith.constant 0 : index
    %3 = vector.load %arg2[%c0_3, %c0_4] : memref<256x4xf32, #tpu.memory_space<vmem>>, vector<256x4xf32>
    %c0_5 = arith.constant 0 : index
    %c0_6 = arith.constant 0 : index
    %4 = vector.load %arg4[%c0_5, %c0_6] : memref<4x128xf32, #tpu.memory_space<vmem>>, vector<4x128xf32>
    %cst_7 = arith.constant dense<0.000000e+00> : vector<256x128xf32>
    %5 = tpu.matmul %3, %4, %cst_7 {dimension_numbers = #tpu.dot_dimension_numbers<[1], [0], [0], [1], [0, 0, 1, 1], [], []>} : vector<256x4xf32>, vector<4x128xf32>, vector<256x128xf32> -> vector<256x128xf32>
    %6 = arith.addf %2, %5 : vector<256x128xf32>
    %c0_8 = arith.constant 0 : index
    %c0_9 = arith.constant 0 : index
    %7 = vector.load %arg5[%c0_8, %c0_9] : memref<1x128xf32, #tpu.memory_space<vmem>>, vector<1x128xf32>
    %8 = vector.broadcast %7 : vector<1x128xf32> to vector<256x128xf32>
    %9 = arith.addf %6, %8 : vector<256x128xf32>
    %cst_10 = arith.constant 0.000000e+00 : f32
    %10 = vector.broadcast %cst_10 : f32 to vector<256x128xf32>
    %11 = arith.maximumf %9, %10 : vector<256x128xf32>
    %c0_11 = arith.constant 0 : index
    %c0_12 = arith.constant 0 : index
    %12 = vector.load %arg6[%c0_11, %c0_12] : memref<128x256xf32, #tpu.memory_space<vmem>>, vector<128x256xf32>
    %cst_13 = arith.constant dense<0.000000e+00> : vector<256x256xf32>
    %13 = tpu.matmul %11, %12, %cst_13 {dimension_numbers = #tpu.dot_dimension_numbers<[1], [0], [0], [1], [0, 0, 1, 1], [], []>} : vector<256x128xf32>, vector<128x256xf32>, vector<256x256xf32> -> vector<256x256xf32>
    %c0_14 = arith.constant 0 : index
    %c0_15 = arith.constant 0 : index
    %14 = vector.load %arg7[%c0_14, %c0_15] : memref<1x256xf32, #tpu.memory_space<vmem>>, vector<1x256xf32>
    %15 = vector.broadcast %14 : vector<1x256xf32> to vector<256x256xf32>
    %16 = arith.addf %13, %15 : vector<256x256xf32>
    %cst_16 = arith.constant 0.000000e+00 : f32
    %17 = vector.broadcast %cst_16 : f32 to vector<256x256xf32>
    %18 = arith.maximumf %16, %17 : vector<256x256xf32>
    %c0_17 = arith.constant 0 : index
    %c0_18 = arith.constant 0 : index
    %19 = vector.load %arg8[%c0_17, %c0_18] : memref<256x128xf32, #tpu.memory_space<vmem>>, vector<256x128xf32>
    %cst_19 = arith.constant dense<0.000000e+00> : vector<256x128xf32>
    %20 = tpu.matmul %18, %19, %cst_19 {dimension_numbers = #tpu.dot_dimension_numbers<[1], [0], [0], [1], [0, 0, 1, 1], [], []>} : vector<256x256xf32>, vector<256x128xf32>, vector<256x128xf32> -> vector<256x128xf32>
    %c0_20 = arith.constant 0 : index
    %c0_21 = arith.constant 0 : index
    %21 = vector.load %arg9[%c0_20, %c0_21] : memref<1x128xf32, #tpu.memory_space<vmem>>, vector<1x128xf32>
    %22 = vector.broadcast %21 : vector<1x128xf32> to vector<256x128xf32>
    %23 = arith.addf %20, %22 : vector<256x128xf32>
    %cst_22 = arith.constant 0.000000e+00 : f32
    %24 = vector.broadcast %cst_22 : f32 to vector<256x128xf32>
    %25 = arith.maximumf %23, %24 : vector<256x128xf32>
    %26 = tpu.transpose %25, [1, 0] : vector<256x128xf32> -> vector<128x256xf32>
    %c0_23 = arith.constant 0 : index
    %c0_24 = arith.constant 0 : index
    %27 = vector.load %arg10[%c0_23, %c0_24] : memref<128x1xf32, #tpu.memory_space<vmem>>, vector<128x1xf32>
    %28 = vector.broadcast %27 : vector<128x1xf32> to vector<128x256xf32>
    %29 = arith.mulf %26, %28 : vector<128x256xf32>
    %cst_25 = arith.constant dense<0.000000e+00> : vector<256xf32>
    %30 = vector.multi_reduction <add>, %29, %cst_25 [0] : vector<128x256xf32> to vector<256xf32>
    %31 = vector.shape_cast %30 : vector<256xf32> to vector<1x256xf32>
    %c0_26 = arith.constant 0 : index
    %c0_27 = arith.constant 0 : index
    %32 = vector.load %arg11[%c0_26, %c0_27] : memref<1x1xf32, #tpu.memory_space<vmem>>, vector<1x1xf32>
    %33 = vector.broadcast %32 : vector<1x1xf32> to vector<1x256xf32>
    %34 = arith.addf %31, %33 : vector<1x256xf32>
    %c0_28 = arith.constant 0 : index
    %c0_29 = arith.constant 0 : index
    %35 = vector.load %arg12[%c0_28, %c0_29] : memref<1x256xf32, #tpu.memory_space<vmem>>, vector<1x256xf32>
    tpu.vector_store %arg12[%c0_28, %c0_29], %34 {strides = array<i32>} : memref<1x256xf32, #tpu.memory_space<vmem>>, vector<1x256xf32>,
    return
  }
  func.func @transform_0(%arg0: i32) -> (i32, i32) {
    %c0_i32 = arith.constant 0 : i32
    %c0_i32_0 = arith.constant 0 : i32
    return %arg0, %c0_i32 : i32, i32
  }
  func.func @transform_1(%arg0: i32) -> (i32, i32) {
    %c0_i32 = arith.constant 0 : i32
    %c0_i32_0 = arith.constant 0 : i32
    return %arg0, %c0_i32 : i32, i32
  }
  func.func @transform_2(%arg0: i32) -> (i32, i32) {
    %c0_i32 = arith.constant 0 : i32
    %c0_i32_0 = arith.constant 0 : i32
    %c0_i32_1 = arith.constant 0 : i32
    return %c0_i32, %c0_i32_0 : i32, i32
  }
  func.func @transform_3(%arg0: i32) -> (i32, i32) {
    %c0_i32 = arith.constant 0 : i32
    %c0_i32_0 = arith.constant 0 : i32
    %c0_i32_1 = arith.constant 0 : i32
    return %c0_i32, %c0_i32_0 : i32, i32
  }
  func.func @transform_4(%arg0: i32) -> (i32, i32) {
    %c0_i32 = arith.constant 0 : i32
    %c0_i32_0 = arith.constant 0 : i32
    %c0_i32_1 = arith.constant 0 : i32
    return %c0_i32, %c0_i32_0 : i32, i32
  }
  func.func @transform_5(%arg0: i32) -> (i32, i32) {
    %c0_i32 = arith.constant 0 : i32
    %c0_i32_0 = arith.constant 0 : i32
    %c0_i32_1 = arith.constant 0 : i32
    return %c0_i32, %c0_i32_0 : i32, i32
  }
  func.func @transform_6(%arg0: i32) -> (i32, i32) {
    %c0_i32 = arith.constant 0 : i32
    %c0_i32_0 = arith.constant 0 : i32
    %c0_i32_1 = arith.constant 0 : i32
    return %c0_i32, %c0_i32_0 : i32, i32
  }
  func.func @transform_7(%arg0: i32) -> (i32, i32) {
    %c0_i32 = arith.constant 0 : i32
    %c0_i32_0 = arith.constant 0 : i32
    %c0_i32_1 = arith.constant 0 : i32
    return %c0_i32, %c0_i32_0 : i32, i32
  }
  func.func @transform_8(%arg0: i32) -> (i32, i32) {
    %c0_i32 = arith.constant 0 : i32
    %c0_i32_0 = arith.constant 0 : i32
    %c0_i32_1 = arith.constant 0 : i32
    return %c0_i32, %c0_i32_0 : i32, i32
  }
  func.func @transform_9(%arg0: i32) -> (i32, i32) {
    %c0_i32 = arith.constant 0 : i32
    %c0_i32_0 = arith.constant 0 : i32
    %c0_i32_1 = arith.constant 0 : i32
    return %c0_i32, %c0_i32_0 : i32, i32
  }
  func.func @transform_10(%arg0: i32) -> (i32, i32) {
    %c0_i32 = arith.constant 0 : i32
    %c0_i32_0 = arith.constant 0 : i32
    %c0_i32_1 = arith.constant 0 : i32
    return %c0_i32, %c0_i32_0 : i32, i32
  }
  func.func @transform_11(%arg0: i32) -> (i32, i32) {
    %c0_i32 = arith.constant 0 : i32
    %c0_i32_0 = arith.constant 0 : i32
    return %c0_i32, %arg0 : i32, i32
  }
}

</mosaic_0001>

<bundles_post_ra>
// kernel: tpu_custom_call.1
= control target key start
LH: loop header
LB: loop body
LE: loop exit
PB: predicated region body
PF: predicated region fallthrough
CT: control target
= control target key end

     0   :  { %s2858_s0 = inlined_call_operand.vmem [shape: f32[256,12], index: 0, kind: input, shape index: {}]   ;;  %s2859_s1 = inlined_call_operand.vmem [shape: f32[256,4], index: 1, kind: input, shape index: {}]   ;;  %s2860_s2 = inlined_call_operand.vmem [shape: f32[12,128], index: 2, kind: input, shape index: {}]   ;;  %s2861_s3 = inlined_call_operand.vmem [shape: f32[4,128], index: 3, kind: input, shape index: {}]   ;;  %s2862_s4 = inlined_call_operand.vmem [shape: f32[1,128], index: 4, kind: input, shape index: {}]   ;;  %s2863_s5 = inlined_call_operand.vmem [shape: f32[128,256], index: 5, kind: input, shape index: {}]   ;;  %s2864_s6 = inlined_call_operand.vmem [shape: f32[1,256], index: 6, kind: input, shape index: {}]   ;;  %s2865_s7 = inlined_call_operand.vmem [shape: f32[256,128], index: 7, kind: input, shape index: {}]   ;;  %s2866_s8 = inlined_call_operand.vmem [shape: f32[1,128], index: 8, kind: input, shape index: {}]   ;;  %s2867_s9 = inlined_call_operand.vmem [shape: f32[128,1], index: 9, kind: input, shape index: {}]   ;;  %s2868_s10 = inlined_call_operand.<no memory space> [shape: f32[1,1], index: 10, kind: input, shape index: {}]   ;;  %s2869_s11 = inlined_call_operand.hbm [shape: f32[1,256], index: 11, kind: output, shape index: {}]  }
   0x1   :  { %v16_v0 = vstv %s2868_s10 }
   0x2   :  { %17 = vst [vmem:[#allocation2] sm:$0x1] %v16_v0 }
   0x3   :  { %v107_v1 = vld [vmem:[%s2861_s3] sm:$0xf]  ;;  %vm205_vm0 = vcmask 1043456   ;;  %v74_v2 = vld [vmem:[%s2860_s2 + $0x8] sm:$0xf]  ;;  %vm108_vm1 = vcmask 31744  }
   0x4   :  { %v75_v3 = vld [vmem:[%s2859_s1] sm:$0xff]  ;;  %1909 = vmatprep.subr.msk.mxu0 %vm205_vm0, %v107_v1  ;;  %1959 = vmatprep.subr.msk.mxu1 %vm205_vm0, %v74_v2  ;;  %v76_v4 = vld [vmem:[%s2859_s1 + $0x8] sm:$0xff]  ;;  %vm434_vm2 = vcmask 97280   ;;  %v77_v7 = vld [vmem:[%s2859_s1 + $0x10] sm:$0xff] }
   0x5   :  { %v73_v5 = vld [vmem:[%s2860_s2] sm:$0xff]  ;;  %1910 = vmatpush3.msk.msra.mxu0 %vm205_vm0, %v107_v1  ;;  %1911 = vmatprep.mubr.msk.f32.mxu0 %vm108_vm1, %v75_v3  ;;  %v42_v8 = vld [vmem:[%s2858_s0 + $0x8] sm:$0xff]  ;;  %v43_v9 = vld [vmem:[%s2858_s0 + $0x10] sm:$0xff] }
   0x6   :  { %v41_v6 = vld [vmem:[%s2858_s0] sm:$0xff]  ;;  %1960 = vmatpush3.msk.msra.mxu1 %vm205_vm0, %v74_v2  ;;  %1912 = vmatmul.mubr.msk.f32.vlgmr.msra.gmra.mxu0 %vm108_vm1, %v76_v4  ;;  %v78_v10 = vld [vmem:[%s2859_s1 + $0x18] sm:$0xff]  ;;  %v80_v14 = vld [vmem:[%s2859_s1 + $0x28] sm:$0xff] }
   0x7   :  { %1961 = vmatprep.subr.mxu1 %v73_v5  ;;  %1963 = vmatprep.mubr.msk.f32.mxu1 %vm434_vm2, %v41_v6  ;;  %v79_v11 = vld [vmem:[%s2859_s1 + $0x20] sm:$0xff]  ;;  %v44_v12 = vld [vmem:[%s2858_s0 + $0x18] sm:$0xff]  ;;  %v81_v15 = vld [vmem:[%s2859_s1 + $0x30] sm:$0xff] }
   0x8   :  { %1962 = vmatpush3.msra.mxu1 %v73_v5  ;;  %1914 = vmatprep.mubr.msk.f32.mxu0 %vm108_vm1, %v77_v7  ;;  %v45_v13 = vld [vmem:[%s2858_s0 + $0x20] sm:$0xff]  ;;  %v46_v16 = vld [vmem:[%s2858_s0 + $0x28] sm:$0xff]  ;;  %v47_v17 = vld [vmem:[%s2858_s0 + $0x30] sm:$0xff] }
   0x9   :  { %1964 = vmatmul.mubr.msk.f32.vlgmr.msra.gmra.mxu1 %vm434_vm2, %v42_v8  ;;  %v82_v18 = vld [vmem:[%s2859_s1 + $0x38] sm:$0xff]  ;;  %v83_v19 = vld [vmem:[%s2859_s1 + $0x40] sm:$0xff]  ;;  %v84_v22 = vld [vmem:[%s2859_s1 + $0x48] sm:$0xff] }
   0xa   :  { %1966 = vmatprep.mubr.msk.f32.mxu1 %vm434_vm2, %v43_v9  ;;  %1915 = vmatmul.mubr.msk.f32.gmra.mxu0 %vm108_vm1, %v78_v10  ;;  %v48_v20 = vld [vmem:[%s2858_s0 + $0x38] sm:$0xff]  ;;  %v49_v21 = vld [vmem:[%s2858_s0 + $0x40] sm:$0xff]  ;;  %v85_v23 = vld [vmem:[%s2859_s1 + $0x50] sm:$0xff] }
   0xb   :  { %1917 = vmatprep.mubr.msk.f32.mxu0 %vm108_vm1, %v79_v11  ;;  %v50_v24 = vld [vmem:[%s2858_s0 + $0x48] sm:$0xff]  ;;  %v51_v25 = vld [vmem:[%s2858_s0 + $0x50] sm:$0xff]  ;;  %v86_v26 = vld [vmem:[%s2859_s1 + $0x58] sm:$0xff] }
   0xc   :  { %v87_v27 = vld [vmem:[%s2859_s1 + $0x60] sm:$0xff]  ;;  %v861_v28 = vld [vmem:[%s2863_s5 + $0xf8] sm:$0xff]  ;;  %v860_v29 = vld [vmem:[%s2863_s5 + $0xf0] sm:$0xff] }
   0xd   :  { %1967 = vmatmul.mubr.msk.f32.gmra.mxu1 %vm434_vm2, %v44_v12  ;;  %v52_v30 = vld [vmem:[%s2858_s0 + $0x58] sm:$0xff]  ;;  %v859_v31 = vld [vmem:[%s2863_s5 + $0xe8] sm:$0xff]  ;;  %v53_v32 = vld [vmem:[%s2858_s0 + $0x60] sm:$0xff]  ;;  %874 = vmatprep.subr.mxu0 %v861_v28 }
   0xe   :  { %1969 = vmatprep.mubr.msk.f32.mxu1 %vm434_vm2, %v45_v13  ;;  %1918 = vmatmul.mubr.msk.f32.gmra.mxu0 %vm108_vm1, %v80_v14  ;;  %v88_v33 = vld [vmem:[%s2859_s1 + $0x68] sm:$0xff]  ;;  %v89_v34 = vld [vmem:[%s2859_s1 + $0x70] sm:$0xff]  ;;  %v858_v35 = vld [vmem:[%s2863_s5 + $0xe0] sm:$0xff] }
   0xf   :  { %1920 = vmatprep.mubr.msk.f32.mxu0 %vm108_vm1, %v81_v15  ;;  %875 = vmatpush1.msra.mxu0 %v860_v29  ;;  %v857_v36 = vld [vmem:[%s2863_s5 + $0xd8] sm:$0xff]  ;;  %v54_v37 = vld [vmem:[%s2858_s0 + $0x68] sm:$0xff]  ;;  %v856_v38 = vld [vmem:[%s2863_s5 + $0xd0] sm:$0xff] }
  0x10   :  { %876 = vmatprep.subr.mxu0 %v859_v31  ;;  %v55_v39 = vld [vmem:[%s2858_s0 + $0x70] sm:$0xff]  ;;  %v90_v40 = vld [vmem:[%s2859_s1 + $0x78] sm:$0xff]  ;;  %v91_v41 = vld [vmem:[%s2859_s1 + $0x80] sm:$0xff] }
  0x11   :  { %1970 = vmatmul.mubr.msk.f32.gmra.mxu1 %vm434_vm2, %v46_v16  ;;  %877 = vmatpush1.msra.mxu0 %v858_v35  ;;  %v855_v42 = vld [vmem:[%s2863_s5 + $0xc8] sm:$0xff]  ;;  %v854_v43 = vld [vmem:[%s2863_s5 + $0xc0] sm:$0xff]  ;;  %v56_v44 = vld [vmem:[%s2858_s0 + $0x78] sm:$0xff] }
  0x12   :  { %1972 = vmatprep.mubr.msk.f32.mxu1 %vm434_vm2, %v47_v17  ;;  %1921 = vmatmul.mubr.msk.f32.gmra.mxu0 %vm108_vm1, %v82_v18  ;;  %v853_v45 = vld [vmem:[%s2863_s5 + $0xb8] sm:$0xff] }
  0x13   :  { %1923 = vmatprep.mubr.msk.f32.mxu0 %vm108_vm1, %v83_v19  ;;  %878 = vmatprep.subr.mxu0 %v857_v36 }
  0x14   :  { %879 = vmatpush1.msra.mxu0 %v856_v38 }
  0x15   :  { %1973 = vmatmul.mubr.msk.f32.gmra.mxu1 %vm434_vm2, %v48_v20 }
  0x16   :  { %1975 = vmatprep.mubr.msk.f32.mxu1 %vm434_vm2, %v49_v21  ;;  %1924 = vmatmul.mubr.msk.f32.gmra.mxu0 %vm108_vm1, %v84_v22 }
  0x17   :  { %1926 = vmatprep.mubr.msk.f32.mxu0 %vm108_vm1, %v85_v23 }
  0x19   :  { %1976 = vmatmul.mubr.msk.f32.gmra.mxu1 %vm434_vm2, %v50_v24 }
  0x1a   :  { %1978 = vmatprep.mubr.msk.f32.mxu1 %vm434_vm2, %v51_v25  ;;  %1927 = vmatmul.mubr.msk.f32.gmra.mxu0 %vm108_vm1, %v86_v26 }
  0x1b   :  { %1929 = vmatprep.mubr.msk.f32.mxu0 %vm108_vm1, %v87_v27 }
  0x1d   :  { %1979 = vmatmul.mubr.msk.f32.gmra.mxu1 %vm434_vm2, %v52_v30 }
  0x1e   :  { %1981 = vmatprep.mubr.msk.f32.mxu1 %vm434_vm2, %v53_v32  ;;  %1930 = vmatmul.mubr.msk.f32.gmra.mxu0 %vm108_vm1, %v88_v33 }
  0x1f   :  { %1932 = vmatprep.mubr.msk.f32.mxu0 %vm108_vm1, %v89_v34 }
  0x21   :  { %1982 = vmatmul.mubr.msk.f32.gmra.mxu1 %vm434_vm2, %v54_v37 }
  0x22   :  { %1984 = vmatprep.mubr.msk.f32.mxu1 %vm434_vm2, %v55_v39  ;;  %1933 = vmatmul.mubr.msk.f32.gmra.mxu0 %vm108_vm1, %v90_v40 }
  0x23   :  { %18 = vsyncpa [#allocation4], 0  ;;  %1935 = vmatprep.mubr.msk.f32.mxu0 %vm108_vm1, %v91_v41  ;;  %v57_v46 = vld [vmem:[%s2858_s0 + $0x80] sm:$0xff]  ;;  %v92_v47 = vld [vmem:[%s2859_s1 + $0x88] sm:$0xff]  ;;  %880 = vmatprep.subr.mxu0 %v855_v42  ;;  %v2039_v36 = vmov 0.0  }
  0x24   :  { %v93_v48 = vld [vmem:[%s2859_s1 + $0x90] sm:$0xff]  ;;  %881 = vmatpush1.msra.mxu0 %v854_v43  ;;  %v851_v50 = vld [vmem:[%s2863_s5 + $0xa8] sm:$0xff]  ;;  %v850_v52 = vld [vmem:[%s2863_s5 + $0xa0] sm:$0xff]  ;;  %1234 = vmatprep.subr.mxu1 %v2039_v36 }
  0x25   :  { %v852_v49 = vld [vmem:[%s2863_s5 + $0xb0] sm:$0xff]  ;;  %1985 = vmatmul.mubr.msk.f32.gmra.mxu1 %vm434_vm2, %v56_v44  ;;  %882 = vmatprep.subr.mxu0 %v853_v45  ;;  %v58_v51 = vld [vmem:[%s2858_s0 + $0x88] sm:$0xff]  ;;  %v94_v54 = vld [vmem:[%s2859_s1 + $0x98] sm:$0xff] }
  0x26   :  { %1987 = vmatprep.mubr.msk.f32.mxu1 %vm434_vm2, %v57_v46  ;;  %1936 = vmatmul.mubr.msk.f32.gmra.mxu0 %vm108_vm1, %v92_v47  ;;  %v59_v53 = vld [vmem:[%s2858_s0 + $0x90] sm:$0xff]  ;;  %v95_v55 = vld [vmem:[%s2859_s1 + $0xa0] sm:$0xff]  ;;  %v849_v56 = vld [vmem:[%s2863_s5 + $0x98] sm:$0xff] }
  0x27   :  { %1938 = vmatprep.mubr.msk.f32.mxu0 %vm108_vm1, %v93_v48  ;;  %883 = vmatpush1.msra.mxu0 %v852_v49  ;;  %v848_v57 = vld [vmem:[%s2863_s5 + $0x90] sm:$0xff]  ;;  %v60_v58 = vld [vmem:[%s2858_s0 + $0x98] sm:$0xff]  ;;  %v847_v59 = vld [vmem:[%s2863_s5 + $0x88] sm:$0xff] }
  0x28   :  { %884 = vmatprep.subr.mxu0 %v851_v50  ;;  %v61_v60 = vld [vmem:[%s2858_s0 + $0xa0] sm:$0xff]  ;;  %v96_v61 = vld [vmem:[%s2859_s1 + $0xa8] sm:$0xff]  ;;  %v97_v62 = vld [vmem:[%s2859_s1 + $0xb0] sm:$0xff] }
  0x29   :  { %1988 = vmatmul.mubr.msk.f32.gmra.mxu1 %vm434_vm2, %v58_v51  ;;  %885 = vmatpush1.msra.mxu0 %v850_v52  ;;  %v846_v63 = vld [vmem:[%s2863_s5 + $0x80] sm:$0xff]  ;;  %v845_v0 = vld [vmem:[%s2863_s5 + $0x78] sm:$0xff]  ;;  %v62_v1 = vld [vmem:[%s2858_s0 + $0xa8] sm:$0xff] }
  0x2a   :  { %1990 = vmatprep.mubr.msk.f32.mxu1 %vm434_vm2, %v59_v53  ;;  %1939 = vmatmul.mubr.msk.f32.gmra.mxu0 %vm108_vm1, %v94_v54  ;;  %v844_v2 = vld [vmem:[%s2863_s5 + $0x70] sm:$0xff]  ;;  %v98_v4 = vld [vmem:[%s2859_s1 + $0xb8] sm:$0xff]  ;;  %v99_v5 = vld [vmem:[%s2859_s1 + $0xc0] sm:$0xff] }
  0x2b   :  { %1941 = vmatprep.mubr.msk.f32.mxu0 %vm108_vm1, %v95_v55  ;;  %886 = vmatprep.subr.mxu0 %v849_v56  ;;  %v63_v3 = vld [vmem:[%s2858_s0 + $0xb0] sm:$0xff]  ;;  %v843_v6 = vld [vmem:[%s2863_s5 + $0x68] sm:$0xff]  ;;  %v842_v7 = vld [vmem:[%s2863_s5 + $0x60] sm:$0xff] }
  0x2c   :  { %887 = vmatpush1.msra.mxu0 %v848_v57  ;;  %v64_v8 = vld [vmem:[%s2858_s0 + $0xb8] sm:$0xff]  ;;  %v65_v10 = vld [vmem:[%s2858_s0 + $0xc0] sm:$0xff]  ;;  %v100_v11 = vld [vmem:[%s2859_s1 + $0xc8] sm:$0xff] }
  0x2d   :  { %1991 = vmatmul.mubr.msk.f32.gmra.mxu1 %vm434_vm2, %v60_v58  ;;  %888 = vmatprep.subr.mxu0 %v847_v59  ;;  %v841_v9 = vld [vmem:[%s2863_s5 + $0x58] sm:$0xff]  ;;  %v101_v12 = vld [vmem:[%s2859_s1 + $0xd0] sm:$0xff]  ;;  %v839_v14 = vld [vmem:[%s2863_s5 + $0x48] sm:$0xff] }
  0x2e   :  { %1993 = vmatprep.mubr.msk.f32.mxu1 %vm434_vm2, %v61_v60  ;;  %1942 = vmatmul.mubr.msk.f32.gmra.mxu0 %vm108_vm1, %v96_v61  ;;  %v840_v13 = vld [vmem:[%s2863_s5 + $0x50] sm:$0xff]  ;;  %v66_v15 = vld [vmem:[%s2858_s0 + $0xc8] sm:$0xff]  ;;  %v838_v16 = vld [vmem:[%s2863_s5 + $0x40] sm:$0xff] }
  0x2f   :  { %1944 = vmatprep.mubr.msk.f32.mxu0 %vm108_vm1, %v97_v62  ;;  %889 = vmatpush1.msra.mxu0 %v846_v63  ;;  %v67_v17 = vld [vmem:[%s2858_s0 + $0xd0] sm:$0xff]  ;;  %v102_v18 = vld [vmem:[%s2859_s1 + $0xd8] sm:$0xff]  ;;  %v103_v19 = vld [vmem:[%s2859_s1 + $0xe0] sm:$0xff] }
  0x30   :  { %890 = vmatprep.subr.mxu0 %v845_v0  ;;  %v837_v20 = vld [vmem:[%s2863_s5 + $0x38] sm:$0xff]  ;;  %v836_v21 = vld [vmem:[%s2863_s5 + $0x30] sm:$0xff]  ;;  %v835_v23 = vld [vmem:[%s2863_s5 + $0x28] sm:$0xff] }
  0x31   :  { %1994 = vmatmul.mubr.msk.f32.gmra.mxu1 %vm434_vm2, %v62_v1  ;;  %891 = vmatpush1.msra.mxu0 %v844_v2  ;;  %v68_v22 = vld [vmem:[%s2858_s0 + $0xd8] sm:$0xff]  ;;  %v69_v24 = vld [vmem:[%s2858_s0 + $0xe0] sm:$0xff]  ;;  %v104_v25 = vld [vmem:[%s2859_s1 + $0xe8] sm:$0xff] }
  0x32   :  { %1996 = vmatprep.mubr.msk.f32.mxu1 %vm434_vm2, %v63_v3  ;;  %1945 = vmatmul.mubr.msk.f32.gmra.mxu0 %vm108_vm1, %v98_v4  ;;  %v105_v26 = vld [vmem:[%s2859_s1 + $0xf0] sm:$0xff]  ;;  %v834_v27 = vld [vmem:[%s2863_s5 + $0x20] sm:$0xff]  ;;  %v70_v28 = vld [vmem:[%s2858_s0 + $0xe8] sm:$0xff] }
  0x33   :  { %1947 = vmatprep.mubr.msk.f32.mxu0 %vm108_vm1, %v99_v5  ;;  %892 = vmatprep.subr.mxu0 %v843_v6  ;;  %v71_v29 = vld [vmem:[%s2858_s0 + $0xf0] sm:$0xff]  ;;  %v106_v30 = vld [vmem:[%s2859_s1 + $0xf8] sm:$0xff]  ;;  %v831_v34 = vld [vmem:[%s2863_s5 + $0x8] sm:$0xff] }
  0x34   :  { %893 = vmatpush1.msra.mxu0 %v842_v7  ;;  %v72_v31 = vld [vmem:[%s2858_s0 + $0xf8] sm:$0xff]  ;;  %v832_v33 = vld [vmem:[%s2863_s5 + $0x10] sm:$0xff]  ;;  %v830_v35 = vld [vmem:[%s2863_s5] sm:$0xff] }
  0x35   :  { %1997 = vmatmul.mubr.msk.f32.gmra.mxu1 %vm434_vm2, %v64_v8  ;;  %894 = vmatprep.subr.mxu0 %v841_v9  ;;  %v833_v32 = vld [vmem:[%s2863_s5 + $0x18] sm:$0xff]  ;;  %v2472_v44 = vld [vmem:[%s2862_s4] ss:$0 sm:$0xff]  ;;  %v1209_v49 = vld [vmem:[%s2865_s7 + $0x70] sm:$0xff] }
  0x36   :  { %1999 = vmatprep.mubr.msk.f32.mxu1 %vm434_vm2, %v65_v10  ;;  %1948 = vmatmul.mubr.msk.f32.gmra.mxu0 %vm108_vm1, %v100_v11  ;;  %v1210_v48 = vld [vmem:[%s2865_s7 + $0x78] sm:$0xff]  ;;  %v1208_v54 = vld [vmem:[%s2865_s7 + $0x68] sm:$0xff]  ;;  %v1207_v57 = vld [vmem:[%s2865_s7 + $0x60] sm:$0xff] }
  0x37   :  { %1950 = vmatprep.mubr.msk.f32.mxu0 %vm108_vm1, %v101_v12  ;;  %895 = vmatpush1.msra.mxu0 %v840_v13  ;;  %v1206_v61 = vld [vmem:[%s2865_s7 + $0x58] sm:$0xff]  ;;  %v1205_v0 = vld [vmem:[%s2865_s7 + $0x50] sm:$0xff]  ;;  %v1204_v4 = vld [vmem:[%s2865_s7 + $0x48] sm:$0xff] }
  0x38   :  { %896 = vmatprep.subr.mxu0 %v839_v14  ;;  %1235 = vmatpush1.msra.mxu1 %v1210_v48  ;;  %v1203_v7 = vld [vmem:[%s2865_s7 + $0x40] sm:$0xff]  ;;  %v1202_v11 = vld [vmem:[%s2865_s7 + $0x38] sm:$0xff]  ;;  %v1201_v14 = vld [vmem:[%s2865_s7 + $0x30] sm:$0xff] }
  0x39   :  { %2000 = vmatmul.mubr.msk.f32.gmra.mxu1 %vm434_vm2, %v66_v15  ;;  %897 = vmatpush1.msra.mxu0 %v838_v16  ;;  %v1224_v48 = vld [vmem:[%s2865_s7 + $0xe8] sm:$0xff] }
  0x3a   :  { %2002 = vmatprep.mubr.msk.f32.mxu1 %vm434_vm2, %v67_v17  ;;  %1951 = vmatmul.mubr.msk.f32.gmra.mxu0 %vm108_vm1, %v102_v18  ;;  %v1200_v18 = vld [vmem:[%s2865_s7 + $0x28] sm:$0xff] }
  0x3b   :  { %1953 = vmatprep.mubr.msk.f32.mxu0 %vm108_vm1, %v103_v19  ;;  %898 = vmatprep.subr.mxu0 %v837_v20 }
  0x3c   :  { %899 = vmatpush1.msra.mxu0 %v836_v21  ;;  %1236 = vmatprep.subr.mxu1 %v2039_v36  ;;  %v1199_v21 = vld [vmem:[%s2865_s7 + $0x20] sm:$0xff] }
  0x3d   :  { %2003 = vmatmul.mubr.msk.f32.gmra.mxu1 %vm434_vm2, %v68_v22  ;;  %900 = vmatprep.subr.mxu0 %v835_v23 }
  0x3e   :  { %2005 = vmatprep.mubr.msk.f32.mxu1 %vm434_vm2, %v69_v24  ;;  %1954 = vmatmul.mubr.msk.f32.gmra.mxu0 %vm108_vm1, %v104_v25  ;;  %v1198_v25 = vld [vmem:[%s2865_s7 + $0x18] sm:$0xff] }
  0x3f   :  { %1956 = vmatprep.mubr.msk.f32.mxu0 %vm108_vm1, %v105_v26  ;;  %901 = vmatpush1.msra.mxu0 %v834_v27 }
  0x40   :  { %902 = vmatprep.subr.mxu0 %v833_v32  ;;  %1237 = vmatpush1.msra.mxu1 %v1209_v49  ;;  %v1196_v32 = vld [vmem:[%s2865_s7 + $0x8] sm:$0xff] }
  0x41   :  { %2006 = vmatmul.mubr.msk.f32.gmra.mxu1 %vm434_vm2, %v70_v28  ;;  %903 = vmatpush1.msra.mxu0 %v832_v33  ;;  %v1197_v28 = vld [vmem:[%s2865_s7 + $0x10] sm:$0xff] }
  0x42   :  { %2008 = vmatprep.mubr.msk.f32.mxu1 %vm434_vm2, %v71_v29  ;;  %1957 = vmatmul.mubr.msk.f32.gmra.mxu0 %vm108_vm1, %v106_v30 }
  0x43   :  { %904 = vmatprep.subr.mxu0 %v831_v34  ;;  %938 = vmatprep.mubr.f32.mxu0 %v2039_v36 }
  0x44   :  { %905 = vmatpush1.msra.mxu0 %v830_v35  ;;  %1238 = vmatprep.subr.mxu1 %v2039_v36  ;;  %v1195_v35 = vld [vmem:[%s2865_s7] sm:$0xff] }
  0x45   :  { %2009 = vmatmul.mubr.msk.f32.gmra.mxu1 %vm434_vm2, %v72_v31 }
  0x46   :  { %1239 = vmatpush1.msra.mxu1 %v1208_v54 }
  0x47   :  { %1240 = vmatprep.subr.mxu1 %v2039_v36 }
  0x48   :  { %1241 = vmatpush1.msra.mxu1 %v1207_v57 }
  0x49   :  { %1242 = vmatprep.subr.mxu1 %v2039_v36 }
  0x4a   :  { %1243 = vmatpush1.msra.mxu1 %v1206_v61 }
  0x4b   :  { %1244 = vmatprep.subr.mxu1 %v2039_v36 }
  0x4c   :  { %1245 = vmatpush1.msra.mxu1 %v1205_v0 }
  0x4d   :  { %1246 = vmatprep.subr.mxu1 %v2039_v36 }
  0x4e   :  { %1247 = vmatpush1.msra.mxu1 %v1204_v4 }
  0x4f   :  { %1248 = vmatprep.subr.mxu1 %v2039_v36 }
  0x50   :  { %1249 = vmatpush1.msra.mxu1 %v1203_v7 }
  0x51   :  { %1250 = vmatprep.subr.mxu1 %v2039_v36 }
  0x52   :  { %1251 = vmatpush1.msra.mxu1 %v1202_v11 }
  0x53   :  { %1252 = vmatprep.subr.mxu1 %v2039_v36 }
  0x54   :  { %1253 = vmatpush1.msra.mxu1 %v1201_v14 }
  0x55   :  { %1254 = vmatprep.subr.mxu1 %v2039_v36 }
  0x56   :  { %1255 = vmatpush1.msra.mxu1 %v1200_v18 }
  0x57   :  { %1256 = vmatprep.subr.mxu1 %v2039_v36 }
  0x58   :  { %1257 = vmatpush1.msra.mxu1 %v1199_v21 }
  0x59   :  { %1258 = vmatprep.subr.mxu1 %v2039_v36 }
  0x5a   :  { %1259 = vmatpush1.msra.mxu1 %v1198_v25 }
  0x5b   :  { %1260 = vmatprep.subr.mxu1 %v2039_v36 }
  0x5c   :  { %1261 = vmatpush1.msra.mxu1 %v1197_v28 }
  0x5d   :  { %1262 = vmatprep.subr.mxu1 %v2039_v36 }
  0x5e   :  { %1263 = vmatpush1.msra.mxu1 %v1196_v32 }
  0x5f   :  { %1264 = vmatprep.subr.mxu1 %v2039_v36 }
  0x60   :  { %1265 = vmatpush1.msra.mxu1 %v1195_v35 }
  0x61   :  { %1266 = vmatprep.subr.mxu1 %v2039_v36 }
  0xc6   :  { %v1913_v37 = vpop.f32.mrf.mxu0 }
  0xc8   :  { %v275_v38 = vpop.f32.mrf.mxu0 }
  0xc9   :  { %v1965_v39 = vpop.f32.mrf.mxu1 }
  0xca   :  { %v1916_v40 = vpop.f32.mrf.mxu0  ;;  %v606_v42 = vadd.f32 %v1965_v39, %v1913_v37 }
  0xcb   :  { %v600_v41 = vpop.f32.mrf.mxu1 }
  0xcc   :  { %v601_v43 = vadd.f32 %v600_v41, %v275_v38  ;;  %v285_v46 = vpop.f32.mrf.mxu0  ;;  %v767_v51 = vadd.f32 %v2472_v44, %v606_v42 }
  0xcd   :  { %v1968_v45 = vpop.f32.mrf.mxu1 }
  0xce   :  { %v766_v47 = vadd.f32 %v2472_v44, %v601_v43  ;;  %v1919_v55 = vpop.f32.mrf.mxu0  ;;  %v799_v58 = vmax.f32 %v767_v51, 0.0  ;;  %v616_v59 = vadd.f32 %v1968_v45, %v1916_v40  ;;  %v1226_v40 = vld [vmem:[%s2865_s7 + $0xf8] sm:$0xff]  ;;  %v1225_v43 = vld [vmem:[%s2865_s7 + $0xf0] sm:$0xff]  ;;  %v1223_v51 = vld [vmem:[%s2865_s7 + $0xe0] sm:$0xff] }
  0xcf   :  { %v610_v50 = vpop.f32.mrf.mxu1  ;;  %1267 = vmatpush2.msra.mxu1 %v1226_v40 }
  0xd0   :  { %v798_v52 = vmax.f32 %v766_v47, 0.0  ;;  %v611_v53 = vadd.f32 %v610_v50, %v285_v46  ;;  %v295_v62 = vpop.f32.mrf.mxu0  ;;  %v769_v1 = vadd.f32 %v2472_v44, %v616_v59  ;;  %1268 = vmatprep.subr.mxu1 %v2039_v36 }
  0xd1   :  { %v1971_v56 = vpop.f32.mrf.mxu1  ;;  %1269 = vmatpush2.msra.mxu1 %v1225_v43 }
  0xd2   :  { %939 = vmatmul.mubr.f32.vlgmr.msra.gmra.mxu0 %v798_v52  ;;  %v768_v60 = vadd.f32 %v2472_v44, %v611_v53  ;;  %v1922_v5 = vpop.f32.mrf.mxu0  ;;  %v801_v8 = vmax.f32 %v769_v1, 0.0  ;;  %v626_v9 = vadd.f32 %v1971_v56, %v1919_v55  ;;  %1270 = vmatprep.subr.mxu1 %v2039_v36  ;;  %v1222_v55 = vld [vmem:[%s2865_s7 + $0xd8] sm:$0xff]  ;;  %v1219_v1 = vld [vmem:[%s2865_s7 + $0xc0] sm:$0xff] }
  0xd3   :  { %944 = vmatprep.mubr.f32.mxu0 %v2039_v36  ;;  %v620_v63 = vpop.f32.mrf.mxu1  ;;  %1271 = vmatpush2.msra.mxu1 %v1224_v48 }
  0xd4   :  { %v800_v2 = vmax.f32 %v768_v60, 0.0  ;;  %v621_v3 = vadd.f32 %v620_v63, %v295_v62  ;;  %v305_v12 = vpop.f32.mrf.mxu0  ;;  %v771_v15 = vadd.f32 %v2472_v44, %v626_v9  ;;  %1272 = vmatprep.subr.mxu1 %v2039_v36  ;;  %v1220_v62 = vld [vmem:[%s2865_s7 + $0xc8] sm:$0xff] }
  0xd5   :  { %v1974_v6 = vpop.f32.mrf.mxu1  ;;  %1273 = vmatpush2.msra.mxu1 %v1223_v51 }
  0xd6   :  { %945 = vmatmul.mubr.f32.gmra.mxu0 %v799_v58  ;;  %v770_v10 = vadd.f32 %v2472_v44, %v621_v3  ;;  %v1925_v19 = vpop.f32.mrf.mxu0  ;;  %v803_v22 = vmax.f32 %v771_v15, 0.0  ;;  %v636_v23 = vadd.f32 %v1974_v6, %v1922_v5  ;;  %1274 = vmatprep.subr.mxu1 %v2039_v36  ;;  %v1221_v58 = vld [vmem:[%s2865_s7 + $0xd0] sm:$0xff]  ;;  %v1218_v5 = vld [vmem:[%s2865_s7 + $0xb8] sm:$0xff]  ;;  %v1215_v15 = vld [vmem:[%s2865_s7 + $0xa0] sm:$0xff] }
  0xd7   :  { %950 = vmatprep.mubr.f32.mxu0 %v2039_v36  ;;  %v630_v13 = vpop.f32.mrf.mxu1  ;;  %1275 = vmatpush2.msra.mxu1 %v1222_v55 }
  0xd8   :  { %v802_v16 = vmax.f32 %v770_v10, 0.0  ;;  %v631_v17 = vadd.f32 %v630_v13, %v305_v12  ;;  %v315_v26 = vpop.f32.mrf.mxu0  ;;  %v773_v29 = vadd.f32 %v2472_v44, %v636_v23  ;;  %1276 = vmatprep.subr.mxu1 %v2039_v36  ;;  %v1216_v12 = vld [vmem:[%s2865_s7 + $0xa8] sm:$0xff] }
  0xd9   :  { %v1977_v20 = vpop.f32.mrf.mxu1  ;;  %1277 = vmatpush2.msra.mxu1 %v1221_v58 }
  0xda   :  { %951 = vmatmul.mubr.f32.gmra.mxu0 %v800_v2  ;;  %v772_v24 = vadd.f32 %v2472_v44, %v631_v17  ;;  %v1928_v33 = vpop.f32.mrf.mxu0  ;;  %v805_v37 = vmax.f32 %v773_v29, 0.0  ;;  %v646_v38 = vadd.f32 %v1977_v20, %v1925_v19  ;;  %1278 = vmatprep.subr.mxu1 %v2039_v36 }
  0xdb   :  { %956 = vmatprep.mubr.f32.mxu0 %v2039_v36  ;;  %v640_v27 = vpop.f32.mrf.mxu1  ;;  %1279 = vmatpush2.msra.mxu1 %v1220_v62 }
  0xdc   :  { %v804_v30 = vmax.f32 %v772_v24, 0.0  ;;  %v641_v31 = vadd.f32 %v640_v27, %v315_v26  ;;  %v325_v41 = vpop.f32.mrf.mxu0  ;;  %v775_v45 = vadd.f32 %v2472_v44, %v646_v38  ;;  %1280 = vmatprep.subr.mxu1 %v2039_v36 }
  0xdd   :  { %v1980_v34 = vpop.f32.mrf.mxu1  ;;  %1281 = vmatpush2.msra.mxu1 %v1219_v1 }
  0xde   :  { %957 = vmatmul.mubr.f32.gmra.mxu0 %v801_v8  ;;  %v774_v39 = vadd.f32 %v2472_v44, %v641_v31  ;;  %v1931_v49 = vpop.f32.mrf.mxu0  ;;  %v807_v52 = vmax.f32 %v775_v45, 0.0  ;;  %v656_v53 = vadd.f32 %v1980_v34, %v1928_v33  ;;  %1282 = vmatprep.subr.mxu1 %v2039_v36  ;;  %v1217_v8 = vld [vmem:[%s2865_s7 + $0xb0] sm:$0xff]  ;;  %v1212_v45 = vld [vmem:[%s2865_s7 + $0x88] sm:$0xff] }
  0xdf   :  { %962 = vmatprep.mubr.f32.mxu0 %v2039_v36  ;;  %v650_v42 = vpop.f32.mrf.mxu1  ;;  %1283 = vmatpush2.msra.mxu1 %v1218_v5 }
  0xe0   :  { %v806_v46 = vmax.f32 %v774_v39, 0.0  ;;  %v651_v47 = vadd.f32 %v650_v42, %v325_v41  ;;  %v335_v56 = vpop.f32.mrf.mxu0  ;;  %v777_v59 = vadd.f32 %v2472_v44, %v656_v53  ;;  %1284 = vmatprep.subr.mxu1 %v2039_v36  ;;  %v1213_v41 = vld [vmem:[%s2865_s7 + $0x90] sm:$0xff] }
  0xe1   :  { %v1983_v50 = vpop.f32.mrf.mxu1  ;;  %1285 = vmatpush2.msra.mxu1 %v1217_v8 }
  0xe2   :  { %963 = vmatmul.mubr.f32.gmra.mxu0 %v802_v16  ;;  %v776_v54 = vadd.f32 %v2472_v44, %v651_v47  ;;  %v1934_v63 = vpop.f32.mrf.mxu0  ;;  %v809_v2 = vmax.f32 %v777_v59, 0.0  ;;  %v666_v3 = vadd.f32 %v1983_v50, %v1931_v49  ;;  %1286 = vmatprep.subr.mxu1 %v2039_v36  ;;  %v1211_v49 = vld [vmem:[%s2865_s7 + $0x80] sm:$0xff] }
  0xe3   :  { %968 = vmatprep.mubr.f32.mxu0 %v2039_v36  ;;  %v660_v57 = vpop.f32.mrf.mxu1  ;;  %1287 = vmatpush2.msra.mxu1 %v1216_v12 }
  0xe4   :  { %v808_v60 = vmax.f32 %v776_v54, 0.0  ;;  %v661_v61 = vadd.f32 %v660_v57, %v335_v56  ;;  %v345_v6 = vpop.f32.mrf.mxu0  ;;  %v779_v9 = vadd.f32 %v2472_v44, %v666_v3  ;;  %1288 = vmatprep.subr.mxu1 %v2039_v36 }
  0xe5   :  { %v1986_v0 = vpop.f32.mrf.mxu1  ;;  %1289 = vmatpush2.msra.mxu1 %v1215_v15 }
  0xe6   :  { %969 = vmatmul.mubr.f32.gmra.mxu0 %v803_v22  ;;  %v778_v4 = vadd.f32 %v2472_v44, %v661_v61  ;;  %v1937_v13 = vpop.f32.mrf.mxu0  ;;  %v811_v16 = vmax.f32 %v779_v9, 0.0  ;;  %v676_v17 = vadd.f32 %v1986_v0, %v1934_v63  ;;  %1290 = vmatprep.subr.mxu1 %v2039_v36 }
  0xe7   :  { %974 = vmatprep.mubr.f32.mxu0 %v2039_v36  ;;  %v670_v7 = vpop.f32.mrf.mxu1 }
  0xe8   :  { %v810_v10 = vmax.f32 %v778_v4, 0.0  ;;  %v671_v11 = vadd.f32 %v670_v7, %v345_v6  ;;  %v355_v19 = vpop.f32.mrf.mxu0  ;;  %v781_v21 = vadd.f32 %v2472_v44, %v676_v17 }
  0xe9   :  { %v1989_v14 = vpop.f32.mrf.mxu1 }
  0xea   :  { %975 = vmatmul.mubr.f32.gmra.mxu0 %v804_v30  ;;  %v780_v18 = vadd.f32 %v2472_v44, %v671_v11  ;;  %v1940_v24 = vpop.f32.mrf.mxu0  ;;  %v813_v26 = vmax.f32 %v781_v21, 0.0  ;;  %v686_v27 = vadd.f32 %v1989_v14, %v1937_v13 }
  0xeb   :  { %980 = vmatprep.mubr.f32.mxu0 %v2039_v36  ;;  %v680_v20 = vpop.f32.mrf.mxu1 }
  0xec   :  { %v812_v22 = vmax.f32 %v780_v18, 0.0  ;;  %v681_v23 = vadd.f32 %v680_v20, %v355_v19  ;;  %v365_v29 = vpop.f32.mrf.mxu0  ;;  %v783_v31 = vadd.f32 %v2472_v44, %v686_v27 }
  0xed   :  { %v1992_v25 = vpop.f32.mrf.mxu1 }
  0xee   :  { %981 = vmatmul.mubr.f32.gmra.mxu0 %v805_v37  ;;  %v782_v28 = vadd.f32 %v2472_v44, %v681_v23  ;;  %v1943_v34 = vpop.f32.mrf.mxu0  ;;  %v1214_v37 = vld [vmem:[%s2865_s7 + $0x98] sm:$0xff]  ;;  %v815_v38 = vmax.f32 %v783_v31, 0.0  ;;  %v696_v39 = vadd.f32 %v1992_v25, %v1940_v24 }
  0xef   :  { %986 = vmatprep.mubr.f32.mxu0 %v2039_v36  ;;  %v690_v30 = vpop.f32.mrf.mxu1  ;;  %1291 = vmatpush2.msra.mxu1 %v1214_v37 }
  0xf0   :  { %v814_v32 = vmax.f32 %v782_v28, 0.0  ;;  %v691_v33 = vadd.f32 %v690_v30, %v365_v29  ;;  %1292 = vmatprep.subr.mxu1 %v2039_v36  ;;  %v375_v42 = vpop.f32.mrf.mxu0 }
  0xf1   :  { %v1995_v35 = vpop.f32.mrf.mxu1  ;;  %1293 = vmatpush2.msra.mxu1 %v1213_v41 }
  0xf2   :  { %987 = vmatmul.mubr.f32.gmra.mxu0 %v806_v46  ;;  %v784_v40 = vadd.f32 %v2472_v44, %v691_v33  ;;  %1294 = vmatprep.subr.mxu1 %v2039_v36  ;;  %v785_v46 = vadd.f32 %v2472_v44, %v696_v39  ;;  %v1946_v50 = vpop.f32.mrf.mxu0  ;;  %v706_v53 = vadd.f32 %v1995_v35, %v1943_v34 }
  0xf3   :  { %992 = vmatprep.mubr.f32.mxu0 %v2039_v36  ;;  %v700_v43 = vpop.f32.mrf.mxu1  ;;  %1295 = vmatpush2.msra.mxu1 %v1212_v45 }
  0xf4   :  { %v816_v47 = vmax.f32 %v784_v40, 0.0  ;;  %v701_v48 = vadd.f32 %v700_v43, %v375_v42  ;;  %1296 = vmatprep.subr.mxu1 %v2039_v36  ;;  %v385_v55 = vpop.f32.mrf.mxu0  ;;  %v787_v57 = vadd.f32 %v2472_v44, %v706_v53  ;;  %v864_v43 = vlaneseq }
  0xf5   :  { %v1998_v51 = vpop.f32.mrf.mxu1  ;;  %1297 = vmatpush2.msra.mxu1 %v1211_v49 }
  0xf6   :  { %993 = vmatmul.mubr.f32.gmra.mxu0 %v807_v52  ;;  %v817_v52 = vmax.f32 %v785_v46, 0.0  ;;  %v786_v54 = vadd.f32 %v2472_v44, %v701_v48  ;;  %v819_v62 = vmax.f32 %v787_v57, 0.0  ;;  %v716_v63 = vadd.f32 %v1998_v51, %v1946_v50  ;;  %v1556_v57 = vld [vmem:[%s2867_s9 + $0x8] sm:$0xff] }
  0xf7   :  { %998 = vmatprep.mubr.f32.mxu0 %v2039_v36  ;;  %v710_v56 = vpop.f32.mrf.mxu1  ;;  %v2665_v45 = vshrl.u32 %v864_v43, 7  ;;  %vm1757_vm3 = vcmp.lt.s32.totalorder %v864_v43, 256 }
  0xf8   :  { %v818_v58 = vmax.f32 %v786_v54, 0.0  ;;  %v711_v59 = vadd.f32 %v710_v56, %v385_v55  ;;  %v789_v3 = vadd.f32 %v2472_v44, %v716_v63  ;;  %v1555_v54 = vld [vmem:[%s2867_s9] sm:$0xff]  ;;  %v2040_v56 = vmov 0   ;;  %v1557_v63 = vld [vmem:[%s2867_s9 + $0x10] sm:$0xff] }
  0xf9   :  { %v2001_v61 = vpop.f32.mrf.mxu1  ;;  %v866_v46 = vsub.s32 0, %v2665_v45  ;;  %v870_v48 = vsub.s32 1, %v2665_v45  ;;  %2015 = vset.pattern.permute.xlu0 %v2040_v56  ;;  %2016 = vset.pattern.permute.xlu1 %v2040_v56 }
  0xfa   :  { %999 = vmatmul.mubr.f32.gmra.mxu0 %v808_v60  ;;  %v1949_v60 = vpop.f32.mrf.mxu0  ;;  %v788_v0 = vadd.f32 %v2472_v44, %v711_v59  ;;  %v821_v8 = vmax.f32 %v789_v3, 0.0  ;;  %1573 = vperm.xlu0 %2015, %v1555_v54  }
  0xfb   :  { %1004 = vmatprep.mubr.f32.mxu0 %v2039_v36  ;;  %v726_v9 = vadd.f32 %v2001_v61, %v1949_v60  ;;  %1578 = vperm.xlu1 %2016, %v1556_v57   ;;  %v1569_v57 = vld [vmem:[%s2867_s9 + $0x70] sm:$0xff] }
  0xfc   :  { %v395_v1 = vpop.f32.mrf.mxu0  ;;  %v820_v4 = vmax.f32 %v788_v0, 0.0 }
  0xfd   :  { %v791_v13 = vadd.f32 %v2472_v44, %v726_v9 }
  0xfe   :  { %1005 = vmatmul.mubr.f32.gmra.mxu0 %v809_v2  ;;  %v720_v2 = vpop.f32.mrf.mxu1  ;;  %v1952_v6 = vpop.f32.mrf.mxu0 }
  0xff   :  { %1010 = vmatprep.mubr.f32.mxu0 %v2039_v36  ;;  %v721_v5 = vadd.f32 %v720_v2, %v395_v1  ;;  %v823_v18 = vmax.f32 %v791_v13, 0.0  ;;  %1583 = vperm.xlu1 %2016, %v1557_v63  }
 0x100   :  { %v2004_v7 = vpop.f32.mrf.mxu1  ;;  %v405_v11 = vpop.f32.mrf.mxu0 }
 0x101   :  { %v736_v19 = vadd.f32 %v2004_v7, %v1952_v6  ;;  %v1562_v6 = vld [vmem:[%s2867_s9 + $0x38] sm:$0xff] }
 0x102   :  { %1011 = vmatmul.mubr.f32.gmra.mxu0 %v810_v10  ;;  %v790_v10 = vadd.f32 %v2472_v44, %v721_v5  ;;  %v730_v12 = vpop.f32.mrf.mxu1  ;;  %v1558_v7 = vld [vmem:[%s2867_s9 + $0x18] sm:$0xff] }
 0x103   :  { %1016 = vmatprep.mubr.f32.mxu0 %v2039_v36  ;;  %v731_v15 = vadd.f32 %v730_v12, %v405_v11  ;;  %v793_v23 = vadd.f32 %v2472_v44, %v736_v19  ;;  %1588 = vperm.xlu1 %2016, %v1558_v7  }
 0x104   :  { %v822_v14 = vmax.f32 %v790_v10, 0.0  ;;  %v2007_v17 = vpop.f32.mrf.mxu1 }
 0x105   :  { %v792_v20 = vadd.f32 %v2472_v44, %v731_v15  ;;  %v825_v28 = vmax.f32 %v793_v23, 0.0  ;;  %v1559_v15 = vld [vmem:[%s2867_s9 + $0x20] sm:$0xff]  ;;  %v1561_v23 = vld [vmem:[%s2867_s9 + $0x30] sm:$0xff] }
 0x106   :  { %1017 = vmatmul.mubr.f32.gmra.mxu0 %v811_v16  ;;  %v1955_v16 = vpop.f32.mrf.mxu0 }
 0x107   :  { %1022 = vmatprep.mubr.f32.mxu0 %v2039_v36  ;;  %v824_v24 = vmax.f32 %v792_v20, 0.0  ;;  %v746_v29 = vadd.f32 %v2007_v17, %v1955_v16  ;;  %1593 = vperm.xlu1 %2016, %v1559_v15  }
 0x108   :  { %v415_v21 = vpop.f32.mrf.mxu0 }
 0x109   :  { %v795_v33 = vadd.f32 %v2472_v44, %v746_v29 }
 0x10a   :  { %1023 = vmatmul.mubr.f32.gmra.mxu0 %v812_v22  ;;  %v740_v22 = vpop.f32.mrf.mxu1 }
 0x10b   :  { %1028 = vmatprep.mubr.f32.mxu0 %v2039_v36  ;;  %v741_v25 = vadd.f32 %v740_v22, %v415_v21  ;;  %v827_v37 = vmax.f32 %v795_v33, 0.0  ;;  %v1566_v22 = vld [vmem:[%s2867_s9 + $0x58] sm:$0xff]  ;;  %1603 = vperm.xlu1 %2016, %v1561_v23  }
 0x10c   :  { %v2010_v27 = vpop.f32.mrf.mxu1 }
 0x10d   :  { %v794_v30 = vadd.f32 %v2472_v44, %v741_v25 }
 0x10e   :  { %1029 = vmatmul.mubr.f32.gmra.mxu0 %v813_v26  ;;  %v1958_v26 = vpop.f32.mrf.mxu0 }
 0x10f   :  { %1034 = vmatprep.mubr.f32.mxu0 %v2039_v36  ;;  %v826_v34 = vmax.f32 %v794_v30, 0.0  ;;  %v1568_v30 = vld [vmem:[%s2867_s9 + $0x68] sm:$0xff] }
 0x110   :  { %v425_v31 = vpop.f32.mrf.mxu0 }
 0x112   :  { %1035 = vmatmul.mubr.f32.gmra.mxu0 %v814_v32  ;;  %v750_v32 = vpop.f32.mrf.mxu1 }
 0x113   :  { %1040 = vmatprep.mubr.f32.mxu0 %v2039_v36  ;;  %v751_v35 = vadd.f32 %v750_v32, %v425_v31  ;;  %v1563_v31 = vld [vmem:[%s2867_s9 + $0x40] sm:$0xff] }
 0x114   :  { %1613 = vperm.xlu1 %2016, %v1563_v31  }
 0x115   :  { %v796_v39 = vadd.f32 %v2472_v44, %v751_v35 }
 0x116   :  { %1041 = vmatmul.mubr.f32.gmra.mxu0 %v815_v38  ;;  %v756_v38 = vadd.f32 %v2010_v27, %v1958_v26 }
 0x117   :  { %1046 = vmatprep.mubr.f32.mxu0 %v2039_v36  ;;  %v828_v41 = vmax.f32 %v796_v39, 0.0  ;;  %v1565_v39 = vld [vmem:[%s2867_s9 + $0x50] sm:$0xff] }
 0x118   :  { %v797_v40 = vadd.f32 %v2472_v44, %v756_v38  ;;  %1623 = vperm.xlu1 %2016, %v1565_v39  }
 0x11a   :  { %1047 = vmatmul.mubr.f32.gmra.mxu0 %v816_v47  ;;  %v829_v42 = vmax.f32 %v797_v40, 0.0  ;;  %v862_v47 = vld [vmem:[%s2864_s6] sm:$0x3] }
 0x11b   :  { %1052 = vmatprep.mubr.f32.mxu0 %v2039_v36  ;;  %v2674_v44 = vrot.slane %v862_v47, %v866_v46  ;;  %v2676_v49 = vrot.slane %v862_v47, %v870_v48 }
 0x11e   :  { %1053 = vmatmul.mubr.f32.gmra.mxu0 %v817_v52 }
 0x11f   :  { %1058 = vmatprep.mubr.f32.mxu0 %v2039_v36 }
 0x122   :  { %1059 = vmatmul.mubr.f32.gmra.mxu0 %v818_v58 }
 0x123   :  { %1064 = vmatprep.mubr.f32.mxu0 %v2039_v36 }
 0x126   :  { %1065 = vmatmul.mubr.f32.gmra.mxu0 %v819_v62  ;;  %v1560_v62 = vld [vmem:[%s2867_s9 + $0x28] sm:$0xff] }
 0x127   :  { %1070 = vmatprep.mubr.f32.mxu0 %v2039_v36  ;;  %1598 = vperm.xlu0 %2015, %v1560_v62  }
 0x12a   :  { %1071 = vmatmul.mubr.f32.gmra.mxu0 %v820_v4 }
 0x12b   :  { %1076 = vmatprep.mubr.f32.mxu0 %v2039_v36  ;;  %1608 = vperm.xlu0 %2015, %v1562_v6  }
 0x12e   :  { %1077 = vmatmul.mubr.f32.gmra.mxu0 %v821_v8 }
 0x12f   :  { %1082 = vmatprep.mubr.f32.mxu0 %v2039_v36 }
 0x132   :  { %1083 = vmatmul.mubr.f32.gmra.mxu0 %v822_v14  ;;  %v1564_v14 = vld [vmem:[%s2867_s9 + $0x48] sm:$0xff] }
 0x133   :  { %1088 = vmatprep.mubr.f32.mxu0 %v2039_v36  ;;  %1618 = vperm.xlu0 %2015, %v1564_v14  }
 0x136   :  { %1089 = vmatmul.mubr.f32.gmra.mxu0 %v823_v18 }
 0x137   :  { %1094 = vmatprep.mubr.f32.mxu0 %v2039_v36  ;;  %1628 = vperm.xlu0 %2015, %v1566_v22  }
 0x13a   :  { %1095 = vmatmul.mubr.f32.gmra.mxu0 %v824_v24 }
 0x13b   :  { %1100 = vmatprep.mubr.f32.mxu0 %v2039_v36  ;;  %1638 = vperm.xlu0 %2015, %v1568_v30  }
 0x13e   :  { %1101 = vmatmul.mubr.f32.gmra.mxu0 %v825_v28 }
 0x13f   :  { %1106 = vmatprep.mubr.f32.mxu0 %v2039_v36 }
 0x142   :  { %1107 = vmatmul.mubr.f32.gmra.mxu0 %v826_v34 }
 0x143   :  { %1112 = vmatprep.mubr.f32.mxu0 %v2039_v36 }
 0x146   :  { %1113 = vmatmul.mubr.f32.gmra.mxu0 %v827_v37 }
 0x147   :  { %1118 = vmatprep.mubr.f32.mxu0 %v2039_v36 }
 0x14a   :  { %1119 = vmatmul.mubr.f32.gmra.mxu0 %v828_v41 }
 0x14b   :  { %1124 = vmatprep.mubr.f32.mxu0 %v2039_v36 }
 0x14e   :  { %1125 = vmatmul.mubr.f32.gmra.mxu0 %v829_v42 }
 0x192   :  { %v940_v36 = vpop.f32.mrf.mxu0 }
 0x193   :  { %v941_v50 = vadd.f32 %v940_v36, %v2674_v44 }
 0x194   :  { %v942_v51 = vpop.f32.mrf.mxu0 }
 0x195   :  { %v943_v52 = vadd.f32 %v942_v51, %v2676_v49  ;;  %v1131_v58 = vmax.f32 %v941_v50, 0.0  ;;  %v1567_v50 = vld [vmem:[%s2867_s9 + $0x60] sm:$0xff] }
 0x196   :  { %v946_v53 = vpop.f32.mrf.mxu0  ;;  %1633 = vperm.xlu1 %2016, %v1567_v50  }
 0x197   :  { %v1132_v55 = vmax.f32 %v943_v52, 0.0  ;;  %v947_v59 = vadd.f32 %v946_v53, %v2674_v44 }
 0x198   :  { %v948_v60 = vpop.f32.mrf.mxu0 }
 0x199   :  { %v949_v61 = vadd.f32 %v948_v60, %v2676_v49  ;;  %1298 = vmatprep.mubr.f32.mxu1 %v1132_v55  ;;  %v1133_v2 = vmax.f32 %v947_v59, 0.0 }
 0x19a   :  { %v952_v0 = vpop.f32.mrf.mxu0  ;;  %1299 = vmatmul.mubr.f32.vlgmr.msra.gmra.mxu1 %v1131_v58  ;;  %1643 = vperm.xlu1 %2016, %v1569_v57  }
 0x19b   :  { %v1134_v1 = vmax.f32 %v949_v61, 0.0  ;;  %v953_v3 = vadd.f32 %v952_v0, %v2674_v44 }
 0x19c   :  { %v954_v4 = vpop.f32.mrf.mxu0 }
 0x19d   :  { %v955_v5 = vadd.f32 %v954_v4, %v2676_v49  ;;  %1303 = vmatprep.mubr.f32.mxu1 %v1134_v1  ;;  %v1135_v10 = vmax.f32 %v953_v3, 0.0 }
 0x19e   :  { %v958_v8 = vpop.f32.mrf.mxu0  ;;  %1304 = vmatmul.mubr.f32.gmra.mxu1 %v1133_v2 }
 0x19f   :  { %v1136_v9 = vmax.f32 %v955_v5, 0.0  ;;  %v959_v11 = vadd.f32 %v958_v8, %v2674_v44 }
 0x1a0   :  { %v960_v12 = vpop.f32.mrf.mxu0 }
 0x1a1   :  { %v961_v13 = vadd.f32 %v960_v12, %v2676_v49  ;;  %1308 = vmatprep.mubr.f32.mxu1 %v1136_v9  ;;  %v1137_v18 = vmax.f32 %v959_v11, 0.0 }
 0x1a2   :  { %v964_v16 = vpop.f32.mrf.mxu0  ;;  %1309 = vmatmul.mubr.f32.gmra.mxu1 %v1135_v10 }
 0x1a3   :  { %v1138_v17 = vmax.f32 %v961_v13, 0.0  ;;  %v965_v19 = vadd.f32 %v964_v16, %v2674_v44 }
 0x1a4   :  { %v966_v20 = vpop.f32.mrf.mxu0 }
 0x1a5   :  { %v967_v21 = vadd.f32 %v966_v20, %v2676_v49  ;;  %1313 = vmatprep.mubr.f32.mxu1 %v1138_v17  ;;  %v1139_v26 = vmax.f32 %v965_v19, 0.0 }
 0x1a6   :  { %v970_v24 = vpop.f32.mrf.mxu0  ;;  %1314 = vmatmul.mubr.f32.gmra.mxu1 %v1137_v18 }
 0x1a7   :  { %v1140_v25 = vmax.f32 %v967_v21, 0.0  ;;  %v971_v27 = vadd.f32 %v970_v24, %v2674_v44 }
 0x1a8   :  { %v972_v28 = vpop.f32.mrf.mxu0 }
 0x1a9   :  { %v973_v29 = vadd.f32 %v972_v28, %v2676_v49  ;;  %1318 = vmatprep.mubr.f32.mxu1 %v1140_v25  ;;  %v1141_v34 = vmax.f32 %v971_v27, 0.0 }
 0x1aa   :  { %v976_v32 = vpop.f32.mrf.mxu0  ;;  %1319 = vmatmul.mubr.f32.gmra.mxu1 %v1139_v26 }
 0x1ab   :  { %v1142_v33 = vmax.f32 %v973_v29, 0.0  ;;  %v977_v35 = vadd.f32 %v976_v32, %v2674_v44 }
 0x1ac   :  { %v978_v37 = vpop.f32.mrf.mxu0 }
 0x1ad   :  { %v979_v38 = vadd.f32 %v978_v37, %v2676_v49  ;;  %1323 = vmatprep.mubr.f32.mxu1 %v1142_v33  ;;  %v1143_v42 = vmax.f32 %v977_v35, 0.0 }
 0x1ae   :  { %v982_v40 = vpop.f32.mrf.mxu0  ;;  %1324 = vmatmul.mubr.f32.gmra.mxu1 %v1141_v34 }
 0x1af   :  { %v1144_v41 = vmax.f32 %v979_v38, 0.0  ;;  %v983_v47 = vadd.f32 %v982_v40, %v2674_v44 }
 0x1b0   :  { %v984_v48 = vpop.f32.mrf.mxu0 }
 0x1b1   :  { %v985_v36 = vadd.f32 %v984_v48, %v2676_v49  ;;  %1328 = vmatprep.mubr.f32.mxu1 %v1144_v41  ;;  %v1145_v53 = vmax.f32 %v983_v47, 0.0 }
 0x1b2   :  { %v988_v51 = vpop.f32.mrf.mxu0  ;;  %1329 = vmatmul.mubr.f32.gmra.mxu1 %v1143_v42 }
 0x1b3   :  { %v1146_v52 = vmax.f32 %v985_v36, 0.0  ;;  %v989_v54 = vadd.f32 %v988_v51, %v2674_v44 }
 0x1b4   :  { %v990_v55 = vpop.f32.mrf.mxu0 }
 0x1b5   :  { %v991_v56 = vadd.f32 %v990_v55, %v2676_v49  ;;  %1333 = vmatprep.mubr.f32.mxu1 %v1146_v52  ;;  %v1147_v60 = vmax.f32 %v989_v54, 0.0 }
 0x1b6   :  { %v994_v58 = vpop.f32.mrf.mxu0  ;;  %1334 = vmatmul.mubr.f32.gmra.mxu1 %v1145_v53 }
 0x1b7   :  { %v1148_v59 = vmax.f32 %v991_v56, 0.0  ;;  %v995_v61 = vadd.f32 %v994_v58, %v2674_v44 }
 0x1b8   :  { %v996_v62 = vpop.f32.mrf.mxu0 }
 0x1b9   :  { %v997_v63 = vadd.f32 %v996_v62, %v2676_v49  ;;  %1338 = vmatprep.mubr.f32.mxu1 %v1148_v59  ;;  %v1149_v2 = vmax.f32 %v995_v61, 0.0 }
 0x1ba   :  { %v1000_v0 = vpop.f32.mrf.mxu0  ;;  %1339 = vmatmul.mubr.f32.gmra.mxu1 %v1147_v60 }
 0x1bb   :  { %v1150_v1 = vmax.f32 %v997_v63, 0.0  ;;  %v1001_v3 = vadd.f32 %v1000_v0, %v2674_v44 }
 0x1bc   :  { %v1002_v4 = vpop.f32.mrf.mxu0 }
 0x1bd   :  { %v1003_v5 = vadd.f32 %v1002_v4, %v2676_v49  ;;  %1343 = vmatprep.mubr.f32.mxu1 %v1150_v1  ;;  %v1151_v8 = vmax.f32 %v1001_v3, 0.0 }
 0x1be   :  { %v1006_v6 = vpop.f32.mrf.mxu0  ;;  %1344 = vmatmul.mubr.f32.gmra.mxu1 %v1149_v2 }
 0x1bf   :  { %v1152_v7 = vmax.f32 %v1003_v5, 0.0  ;;  %v1007_v9 = vadd.f32 %v1006_v6, %v2674_v44 }
 0x1c0   :  { %v1008_v10 = vpop.f32.mrf.mxu0 }
 0x1c1   :  { %v1009_v11 = vadd.f32 %v1008_v10, %v2676_v49  ;;  %1348 = vmatprep.mubr.f32.mxu1 %v1152_v7  ;;  %v1153_v14 = vmax.f32 %v1007_v9, 0.0 }
 0x1c2   :  { %v1012_v12 = vpop.f32.mrf.mxu0  ;;  %1349 = vmatmul.mubr.f32.gmra.mxu1 %v1151_v8 }
 0x1c3   :  { %v1154_v13 = vmax.f32 %v1009_v11, 0.0  ;;  %v1013_v15 = vadd.f32 %v1012_v12, %v2674_v44 }
 0x1c4   :  { %v1014_v16 = vpop.f32.mrf.mxu0 }
 0x1c5   :  { %v1015_v17 = vadd.f32 %v1014_v16, %v2676_v49  ;;  %1353 = vmatprep.mubr.f32.mxu1 %v1154_v13  ;;  %v1155_v20 = vmax.f32 %v1013_v15, 0.0 }
 0x1c6   :  { %v1018_v18 = vpop.f32.mrf.mxu0  ;;  %1354 = vmatmul.mubr.f32.gmra.mxu1 %v1153_v14 }
 0x1c7   :  { %v1156_v19 = vmax.f32 %v1015_v17, 0.0  ;;  %v1019_v21 = vadd.f32 %v1018_v18, %v2674_v44 }
 0x1c8   :  { %v1020_v22 = vpop.f32.mrf.mxu0 }
 0x1c9   :  { %v1021_v23 = vadd.f32 %v1020_v22, %v2676_v49  ;;  %1358 = vmatprep.mubr.f32.mxu1 %v1156_v19  ;;  %v1157_v26 = vmax.f32 %v1019_v21, 0.0 }
 0x1ca   :  { %v1024_v24 = vpop.f32.mrf.mxu0  ;;  %1359 = vmatmul.mubr.f32.gmra.mxu1 %v1155_v20 }
 0x1cb   :  { %v1158_v25 = vmax.f32 %v1021_v23, 0.0  ;;  %v1025_v27 = vadd.f32 %v1024_v24, %v2674_v44 }
 0x1cc   :  { %v1026_v28 = vpop.f32.mrf.mxu0 }
 0x1cd   :  { %v1027_v29 = vadd.f32 %v1026_v28, %v2676_v49  ;;  %1363 = vmatprep.mubr.f32.mxu1 %v1158_v25  ;;  %v1159_v32 = vmax.f32 %v1025_v27, 0.0 }
 0x1ce   :  { %v1030_v30 = vpop.f32.mrf.mxu0  ;;  %1364 = vmatmul.mubr.f32.gmra.mxu1 %v1157_v26 }
 0x1cf   :  { %v1160_v31 = vmax.f32 %v1027_v29, 0.0  ;;  %v1031_v33 = vadd.f32 %v1030_v30, %v2674_v44 }
 0x1d0   :  { %v1032_v34 = vpop.f32.mrf.mxu0 }
 0x1d1   :  { %v1033_v35 = vadd.f32 %v1032_v34, %v2676_v49  ;;  %1368 = vmatprep.mubr.f32.mxu1 %v1160_v31  ;;  %v1161_v39 = vmax.f32 %v1031_v33, 0.0 }
 0x1d2   :  { %v1036_v37 = vpop.f32.mrf.mxu0  ;;  %1369 = vmatmul.mubr.f32.gmra.mxu1 %v1159_v32 }
 0x1d3   :  { %v1162_v38 = vmax.f32 %v1033_v35, 0.0  ;;  %v1037_v40 = vadd.f32 %v1036_v37, %v2674_v44 }
 0x1d4   :  { %v1038_v41 = vpop.f32.mrf.mxu0 }
 0x1d5   :  { %v1039_v42 = vadd.f32 %v1038_v41, %v2676_v49  ;;  %1373 = vmatprep.mubr.f32.mxu1 %v1162_v38  ;;  %v1163_v36 = vmax.f32 %v1037_v40, 0.0 }
 0x1d6   :  { %v1042_v47 = vpop.f32.mrf.mxu0  ;;  %1374 = vmatmul.mubr.f32.gmra.mxu1 %v1161_v39 }
 0x1d7   :  { %v1164_v48 = vmax.f32 %v1039_v42, 0.0  ;;  %v1043_v50 = vadd.f32 %v1042_v47, %v2674_v44 }
 0x1d8   :  { %v1044_v51 = vpop.f32.mrf.mxu0 }
 0x1d9   :  { %v1045_v52 = vadd.f32 %v1044_v51, %v2676_v49  ;;  %1378 = vmatprep.mubr.f32.mxu1 %v1164_v48  ;;  %v1165_v55 = vmax.f32 %v1043_v50, 0.0 }
 0x1da   :  { %v1048_v53 = vpop.f32.mrf.mxu0  ;;  %1379 = vmatmul.mubr.f32.gmra.mxu1 %v1163_v36 }
 0x1db   :  { %v1166_v54 = vmax.f32 %v1045_v52, 0.0  ;;  %v1049_v56 = vadd.f32 %v1048_v53, %v2674_v44 }
 0x1dc   :  { %v1050_v57 = vpop.f32.mrf.mxu0 }
 0x1dd   :  { %v1051_v58 = vadd.f32 %v1050_v57, %v2676_v49  ;;  %1383 = vmatprep.mubr.f32.mxu1 %v1166_v54  ;;  %v1167_v61 = vmax.f32 %v1049_v56, 0.0 }
 0x1de   :  { %v1054_v59 = vpop.f32.mrf.mxu0  ;;  %1384 = vmatmul.mubr.f32.gmra.mxu1 %v1165_v55 }
 0x1df   :  { %v1168_v60 = vmax.f32 %v1051_v58, 0.0  ;;  %v1055_v62 = vadd.f32 %v1054_v59, %v2674_v44 }
 0x1e0   :  { %v1056_v63 = vpop.f32.mrf.mxu0 }
 0x1e1   :  { %v1057_v0 = vadd.f32 %v1056_v63, %v2676_v49  ;;  %1388 = vmatprep.mubr.f32.mxu1 %v1168_v60  ;;  %v1169_v3 = vmax.f32 %v1055_v62, 0.0 }
 0x1e2   :  { %v1060_v1 = vpop.f32.mrf.mxu0  ;;  %1389 = vmatmul.mubr.f32.gmra.mxu1 %v1167_v61 }
 0x1e3   :  { %v1170_v2 = vmax.f32 %v1057_v0, 0.0  ;;  %v1061_v4 = vadd.f32 %v1060_v1, %v2674_v44 }
 0x1e4   :  { %v1062_v5 = vpop.f32.mrf.mxu0 }
 0x1e5   :  { %v1063_v6 = vadd.f32 %v1062_v5, %v2676_v49  ;;  %1393 = vmatprep.mubr.f32.mxu1 %v1170_v2  ;;  %v1171_v9 = vmax.f32 %v1061_v4, 0.0 }
 0x1e6   :  { %v1066_v7 = vpop.f32.mrf.mxu0  ;;  %1394 = vmatmul.mubr.f32.gmra.mxu1 %v1169_v3 }
 0x1e7   :  { %v1172_v8 = vmax.f32 %v1063_v6, 0.0  ;;  %v1067_v10 = vadd.f32 %v1066_v7, %v2674_v44 }
 0x1e8   :  { %v1068_v11 = vpop.f32.mrf.mxu0 }
 0x1e9   :  { %v1069_v12 = vadd.f32 %v1068_v11, %v2676_v49  ;;  %1398 = vmatprep.mubr.f32.mxu1 %v1172_v8  ;;  %v1173_v15 = vmax.f32 %v1067_v10, 0.0 }
 0x1ea   :  { %v1072_v13 = vpop.f32.mrf.mxu0  ;;  %1399 = vmatmul.mubr.f32.gmra.mxu1 %v1171_v9 }
 0x1eb   :  { %v1174_v14 = vmax.f32 %v1069_v12, 0.0  ;;  %v1073_v16 = vadd.f32 %v1072_v13, %v2674_v44 }
 0x1ec   :  { %v1074_v17 = vpop.f32.mrf.mxu0 }
 0x1ed   :  { %v1075_v18 = vadd.f32 %v1074_v17, %v2676_v49  ;;  %1403 = vmatprep.mubr.f32.mxu1 %v1174_v14  ;;  %v1175_v21 = vmax.f32 %v1073_v16, 0.0  ;;  %v2790_v16 = vld [vmem:[%s2866_s8] ss:$0 sm:$0xff] }
 0x1ee   :  { %v1078_v19 = vpop.f32.mrf.mxu0  ;;  %1404 = vmatmul.mubr.f32.gmra.mxu1 %v1173_v15 }
 0x1ef   :  { %v1176_v20 = vmax.f32 %v1075_v18, 0.0  ;;  %v1079_v22 = vadd.f32 %v1078_v19, %v2674_v44 }
 0x1f0   :  { %v1080_v23 = vpop.f32.mrf.mxu0 }
 0x1f1   :  { %v1081_v24 = vadd.f32 %v1080_v23, %v2676_v49  ;;  %1408 = vmatprep.mubr.f32.mxu1 %v1176_v20  ;;  %v1177_v27 = vmax.f32 %v1079_v22, 0.0 }
 0x1f2   :  { %v1084_v25 = vpop.f32.mrf.mxu0  ;;  %1409 = vmatmul.mubr.f32.gmra.mxu1 %v1175_v21 }
 0x1f3   :  { %v1178_v26 = vmax.f32 %v1081_v24, 0.0  ;;  %v1085_v28 = vadd.f32 %v1084_v25, %v2674_v44 }
 0x1f4   :  { %v1086_v29 = vpop.f32.mrf.mxu0 }
 0x1f5   :  { %v1087_v30 = vadd.f32 %v1086_v29, %v2676_v49  ;;  %1413 = vmatprep.mubr.f32.mxu1 %v1178_v26  ;;  %v1179_v33 = vmax.f32 %v1085_v28, 0.0 }
 0x1f6   :  { %v1090_v31 = vpop.f32.mrf.mxu0  ;;  %1414 = vmatmul.mubr.f32.gmra.mxu1 %v1177_v27 }
 0x1f7   :  { %v1180_v32 = vmax.f32 %v1087_v30, 0.0  ;;  %v1091_v34 = vadd.f32 %v1090_v31, %v2674_v44 }
 0x1f8   :  { %v1092_v35 = vpop.f32.mrf.mxu0 }
 0x1f9   :  { %v1093_v37 = vadd.f32 %v1092_v35, %v2676_v49  ;;  %1418 = vmatprep.mubr.f32.mxu1 %v1180_v32  ;;  %v1181_v40 = vmax.f32 %v1091_v34, 0.0 }
 0x1fa   :  { %v1096_v38 = vpop.f32.mrf.mxu0  ;;  %1419 = vmatmul.mubr.f32.gmra.mxu1 %v1179_v33 }
 0x1fb   :  { %v1182_v39 = vmax.f32 %v1093_v37, 0.0  ;;  %v1097_v41 = vadd.f32 %v1096_v38, %v2674_v44 }
 0x1fc   :  { %v1098_v42 = vpop.f32.mrf.mxu0 }
 0x1fd   :  { %v1099_v47 = vadd.f32 %v1098_v42, %v2676_v49  ;;  %1423 = vmatprep.mubr.f32.mxu1 %v1182_v39  ;;  %v1183_v50 = vmax.f32 %v1097_v41, 0.0 }
 0x1fe   :  { %v1102_v48 = vpop.f32.mrf.mxu0  ;;  %1424 = vmatmul.mubr.f32.gmra.mxu1 %v1181_v40 }
 0x1ff   :  { %v1184_v36 = vmax.f32 %v1099_v47, 0.0  ;;  %v1103_v51 = vadd.f32 %v1102_v48, %v2674_v44 }
 0x200   :  { %v1104_v52 = vpop.f32.mrf.mxu0 }
 0x201   :  { %v1105_v53 = vadd.f32 %v1104_v52, %v2676_v49  ;;  %1428 = vmatprep.mubr.f32.mxu1 %v1184_v36  ;;  %v1185_v56 = vmax.f32 %v1103_v51, 0.0 }
 0x202   :  { %v1108_v54 = vpop.f32.mrf.mxu0  ;;  %1429 = vmatmul.mubr.f32.gmra.mxu1 %v1183_v50 }
 0x203   :  { %v1186_v55 = vmax.f32 %v1105_v53, 0.0  ;;  %v1109_v57 = vadd.f32 %v1108_v54, %v2674_v44 }
 0x204   :  { %v1110_v58 = vpop.f32.mrf.mxu0 }
 0x205   :  { %v1111_v59 = vadd.f32 %v1110_v58, %v2676_v49  ;;  %1433 = vmatprep.mubr.f32.mxu1 %v1186_v55  ;;  %v1187_v62 = vmax.f32 %v1109_v57, 0.0 }
 0x206   :  { %v1114_v60 = vpop.f32.mrf.mxu0  ;;  %1434 = vmatmul.mubr.f32.gmra.mxu1 %v1185_v56 }
 0x207   :  { %v1188_v61 = vmax.f32 %v1111_v59, 0.0  ;;  %v1115_v63 = vadd.f32 %v1114_v60, %v2674_v44 }
 0x208   :  { %v1116_v0 = vpop.f32.mrf.mxu0 }
 0x209   :  { %v1117_v1 = vadd.f32 %v1116_v0, %v2676_v49  ;;  %1438 = vmatprep.mubr.f32.mxu1 %v1188_v61  ;;  %v1189_v4 = vmax.f32 %v1115_v63, 0.0 }
 0x20a   :  { %v1120_v2 = vpop.f32.mrf.mxu0  ;;  %1439 = vmatmul.mubr.f32.gmra.mxu1 %v1187_v62 }
 0x20b   :  { %v1190_v3 = vmax.f32 %v1117_v1, 0.0  ;;  %v1121_v5 = vadd.f32 %v1120_v2, %v2674_v44 }
 0x20c   :  { %v1122_v6 = vpop.f32.mrf.mxu0 }
 0x20d   :  { %v1123_v7 = vadd.f32 %v1122_v6, %v2676_v49  ;;  %1443 = vmatprep.mubr.f32.mxu1 %v1190_v3  ;;  %v1191_v10 = vmax.f32 %v1121_v5, 0.0 }
 0x20e   :  { %v1126_v8 = vpop.f32.mrf.mxu0  ;;  %1444 = vmatmul.mubr.f32.gmra.mxu1 %v1189_v4 }
 0x20f   :  { %v1192_v9 = vmax.f32 %v1123_v7, 0.0  ;;  %v1127_v11 = vadd.f32 %v1126_v8, %v2674_v44 }
 0x210   :  { %v1128_v12 = vpop.f32.mrf.mxu0 }
 0x211   :  { %v1129_v13 = vadd.f32 %v1128_v12, %v2676_v49  ;;  %1448 = vmatprep.mubr.f32.mxu1 %v1192_v9  ;;  %v1193_v15 = vmax.f32 %v1127_v11, 0.0 }
 0x212   :  { %1449 = vmatmul.mubr.f32.gmra.mxu1 %v1191_v10 }
 0x213   :  { %v1194_v14 = vmax.f32 %v1129_v13, 0.0 }
 0x215   :  { %1453 = vmatprep.mubr.f32.mxu1 %v1194_v14 }
 0x216   :  { %1454 = vmatmul.mubr.f32.gmra.mxu1 %v1193_v15 }
 0x25a   :  { %v1300_v17 = vpop.f32.mrf.mxu1 }
 0x25b   :  { %v1301_v18 = vadd.f32 %v2790_v16, %v1300_v17 }
 0x25c   :  { %v1302_v19 = vpop.f32.mrf.mxu1 }
 0x25d   :  { %v1459_v20 = vmax.f32 %v1301_v18, 0.0 }
 0x25e   :  { %v1305_v44 = vpop.f32.mrf.mxu1 }
 0x25f   :  { %v1306_v21 = vadd.f32 %v2790_v16, %v1305_v44  ;;  %1491 = vxpose.xlu0.b32.start [1/16] %v1459_v20, 128 }
 0x260   :  { %v1307_v49 = vpop.f32.mrf.mxu1 }
 0x261   :  { %v1460_v22 = vmax.f32 %v1306_v21, 0.0 }
 0x262   :  { %v1310_v23 = vpop.f32.mrf.mxu1 }
 0x263   :  { %v1311_v24 = vadd.f32 %v2790_v16, %v1310_v23  ;;  %1492 = vxpose.xlu0.b32.cont [2/16] %v1460_v22, 128 }
 0x264   :  { %v1312_v25 = vpop.f32.mrf.mxu1 }
 0x265   :  { %v1461_v26 = vmax.f32 %v1311_v24, 0.0 }
 0x266   :  { %v1315_v27 = vpop.f32.mrf.mxu1 }
 0x267   :  { %v1316_v28 = vadd.f32 %v2790_v16, %v1315_v27  ;;  %1493 = vxpose.xlu0.b32.cont [3/16] %v1461_v26, 128 }
 0x268   :  { %v1317_v29 = vpop.f32.mrf.mxu1 }
 0x269   :  { %v1462_v30 = vmax.f32 %v1316_v28, 0.0 }
 0x26a   :  { %v1320_v31 = vpop.f32.mrf.mxu1 }
 0x26b   :  { %v1321_v32 = vadd.f32 %v2790_v16, %v1320_v31  ;;  %1494 = vxpose.xlu0.b32.cont [4/16] %v1462_v30, 128 }
 0x26c   :  { %v1322_v33 = vpop.f32.mrf.mxu1 }
 0x26d   :  { %v1463_v34 = vmax.f32 %v1321_v32, 0.0 }
 0x26e   :  { %v1325_v35 = vpop.f32.mrf.mxu1 }
 0x26f   :  { %v1326_v37 = vadd.f32 %v2790_v16, %v1325_v35  ;;  %1495 = vxpose.xlu0.b32.cont [5/16] %v1463_v34, 128 }
 0x270   :  { %v1327_v38 = vpop.f32.mrf.mxu1 }
 0x271   :  { %v1464_v39 = vmax.f32 %v1326_v37, 0.0 }
 0x272   :  { %v1330_v40 = vpop.f32.mrf.mxu1 }
 0x273   :  { %v1331_v41 = vadd.f32 %v2790_v16, %v1330_v40  ;;  %1496 = vxpose.xlu0.b32.cont [6/16] %v1464_v39, 128 }
 0x274   :  { %v1332_v42 = vpop.f32.mrf.mxu1 }
 0x275   :  { %v1465_v47 = vmax.f32 %v1331_v41, 0.0 }
 0x276   :  { %v1335_v48 = vpop.f32.mrf.mxu1 }
 0x277   :  { %v1336_v36 = vadd.f32 %v2790_v16, %v1335_v48  ;;  %1497 = vxpose.xlu0.b32.cont [7/16] %v1465_v47, 128 }
 0x278   :  { %v1337_v50 = vpop.f32.mrf.mxu1 }
 0x279   :  { %v1466_v51 = vmax.f32 %v1336_v36, 0.0 }
 0x27a   :  { %v1340_v52 = vpop.f32.mrf.mxu1 }
 0x27b   :  { %v1341_v53 = vadd.f32 %v2790_v16, %v1340_v52  ;;  %1498 = vxpose.xlu0.b32.cont [8/16] %v1466_v51, 128 }
 0x27c   :  { %v1342_v54 = vpop.f32.mrf.mxu1 }
 0x27d   :  { %v1467_v55 = vmax.f32 %v1341_v53, 0.0 }
 0x27e   :  { %v1345_v56 = vpop.f32.mrf.mxu1 }
 0x27f   :  { %v1346_v57 = vadd.f32 %v2790_v16, %v1345_v56  ;;  %1499 = vxpose.xlu0.b32.cont [9/16] %v1467_v55, 128  ;;  %v2816_v56 = vpop.permute.xlu0 %1573 }
 0x280   :  { %v1347_v58 = vpop.f32.mrf.mxu1 }
 0x281   :  { %v1468_v59 = vmax.f32 %v1346_v57, 0.0 }
 0x282   :  { %v1350_v60 = vpop.f32.mrf.mxu1 }
 0x283   :  { %v1351_v61 = vadd.f32 %v2790_v16, %v1350_v60  ;;  %1500 = vxpose.xlu0.b32.cont [10/16] %v1468_v59, 128 }
 0x284   :  { %v1352_v62 = vpop.f32.mrf.mxu1 }
 0x285   :  { %v1469_v63 = vmax.f32 %v1351_v61, 0.0 }
 0x286   :  { %v1355_v0 = vpop.f32.mrf.mxu1 }
 0x287   :  { %v1356_v1 = vadd.f32 %v2790_v16, %v1355_v0  ;;  %1501 = vxpose.xlu0.b32.cont [11/16] %v1469_v63, 128  ;;  %v2820_v63 = vpop.permute.xlu0 %1598 }
 0x288   :  { %v1357_v2 = vpop.f32.mrf.mxu1 }
 0x289   :  { %v1470_v3 = vmax.f32 %v1356_v1, 0.0  ;;  %v1570_v2 = vld [vmem:[%s2867_s9 + $0x78] sm:$0xff]  ;;  %s2042_s9 = smov [#allocation3]  }
 0x28a   :  { %v1360_v4 = vpop.f32.mrf.mxu1  ;;  %s1766_s13 = sshll.u32 %s2042_s9, 4  ;;  %s1767_s13 = int_to_ptr.vmem [resolvable:$true] %s1766_s13 }
 0x28b   :  { %v1361_v5 = vadd.f32 %v2790_v16, %v1360_v4  ;;  %1502 = vxpose.xlu0.b32.cont [12/16] %v1470_v3, 128  ;;  %s2017_s2 = scalar_lea.vmem %s1767_s13, 32  ;;  %p2022_p1 = scmp.lt.s32.totalorder %s1767_s13, %s1767_s13 }
 0x28c   :  { %v1362_v6 = vpop.f32.mrf.mxu1  ;;  %p2018_p0 = scmp.ne.s32.totalorder %s1767_s13, %s2017_s2  ;;  %p2023_p2 = scmp.lt.s32.totalorder %s2017_s2, %s2017_s2 }
 0x28d   :  { %v1471_v7 = vmax.f32 %v1361_v5, 0.0 }
 0x28e   :  { %v1365_v8 = vpop.f32.mrf.mxu1  ;;  %p2024_p3 = por %p2023_p2, %p2022_p1 }
 0x28f   :  { %v1366_v9 = vadd.f32 %v2790_v16, %v1365_v8  ;;  %1503 = vxpose.xlu0.b32.cont [13/16] %v1471_v7, 128  ;;  %v2826_v7 = vpop.permute.xlu0 %1608 }
 0x290   :  { %v1367_v10 = vpop.f32.mrf.mxu1  ;;  %p2025_p4 = pnand %p2024_p3, %p2018_p0 }
 0x291   :  { %v1472_v11 = vmax.f32 %v1366_v9, 0.0 }
 0x292   :  { %v1370_v12 = vpop.f32.mrf.mxu1 }
 0x293   :  { %v1371_v13 = vadd.f32 %v2790_v16, %v1370_v12  ;;  %1504 = vxpose.xlu0.b32.cont [14/16] %v1472_v11, 128 }
 0x294   :  { %v1372_v14 = vpop.f32.mrf.mxu1 }
 0x295   :  { %v1473_v15 = vmax.f32 %v1371_v13, 0.0  ;;  %v2829_v13 = vpop.permute.xlu0 %1618 }
 0x296   :  { %v1375_v17 = vpop.f32.mrf.mxu1 }
 0x297   :  { %v1376_v18 = vadd.f32 %v2790_v16, %v1375_v17  ;;  %1505 = vxpose.xlu0.b32.cont [15/16] %v1473_v15, 128 }
 0x298   :  { %v1377_v19 = vpop.f32.mrf.mxu1 }
 0x299   :  { %v1474_v20 = vmax.f32 %v1376_v18, 0.0 }
 0x29a   :  { %v1380_v44 = vpop.f32.mrf.mxu1 }
 0x29b   :  { %v1381_v21 = vadd.f32 %v2790_v16, %v1380_v44  ;;  %1506 = vxpose.xlu0.b32.end [16/16] %v1474_v20, 128  ;;  %v2833_v44 = vpop.permute.xlu0 %1628 }
 0x29c   :  { %v1382_v49 = vpop.f32.mrf.mxu1 }
 0x29d   :  { %v1475_v22 = vmax.f32 %v1381_v21, 0.0 }
 0x29e   :  { %v1385_v23 = vpop.f32.mrf.mxu1 }
 0x29f   :  { %v1386_v24 = vadd.f32 %v2790_v16, %v1385_v23  ;;  %1523 = vxpose.xlu1.b32.start [1/16] %v1475_v22, 128 }
 0x2a0   :  { %v1387_v25 = vpop.f32.mrf.mxu1 }
 0x2a1   :  { %v1476_v26 = vmax.f32 %v1386_v24, 0.0 }
 0x2a2   :  { %v1390_v27 = vpop.f32.mrf.mxu1 }
 0x2a3   :  { %v1391_v28 = vadd.f32 %v2790_v16, %v1390_v27  ;;  %1524 = vxpose.xlu1.b32.cont [2/16] %v1476_v26, 128  ;;  %v2836_v26 = vpop.permute.xlu0 %1638 }
 0x2a4   :  { %v1392_v29 = vpop.f32.mrf.mxu1 }
 0x2a5   :  { %v1477_v30 = vmax.f32 %v1391_v28, 0.0  ;;  %v1579_v29 = vpop.permute.xlu1 %1578 }
 0x2a6   :  { %v1395_v31 = vpop.f32.mrf.mxu1 }
 0x2a7   :  { %v1396_v32 = vadd.f32 %v2790_v16, %v1395_v31  ;;  %1525 = vxpose.xlu1.b32.cont [3/16] %v1477_v30, 128 }
 0x2a8   :  { %v1397_v33 = vpop.f32.mrf.mxu1 }
 0x2a9   :  { %v1478_v34 = vmax.f32 %v1396_v32, 0.0  ;;  %v1584_v32 = vpop.permute.xlu1 %1583 }
 0x2aa   :  { %v1400_v35 = vpop.f32.mrf.mxu1 }
 0x2ab   :  { %v1401_v37 = vadd.f32 %v2790_v16, %v1400_v35  ;;  %1526 = vxpose.xlu1.b32.cont [4/16] %v1478_v34, 128 }
 0x2ac   :  { %v1402_v38 = vpop.f32.mrf.mxu1 }
 0x2ad   :  { %v1479_v39 = vmax.f32 %v1401_v37, 0.0 }
 0x2ae   :  { %v1405_v40 = vpop.f32.mrf.mxu1 }
 0x2af   :  { %v1406_v41 = vadd.f32 %v2790_v16, %v1405_v40  ;;  %1527 = vxpose.xlu1.b32.cont [5/16] %v1479_v39, 128  ;;  %v1589_v39 = vpop.permute.xlu1 %1588 }
 0x2b0   :  { %v1407_v42 = vpop.f32.mrf.mxu1 }
 0x2b1   :  { %v1480_v47 = vmax.f32 %v1406_v41, 0.0 }
 0x2b2   :  { %v1410_v48 = vpop.f32.mrf.mxu1 }
 0x2b3   :  { %v1411_v36 = vadd.f32 %v2790_v16, %v1410_v48  ;;  %1528 = vxpose.xlu1.b32.cont [6/16] %v1480_v47, 128 }
 0x2b4   :  { %v1412_v50 = vpop.f32.mrf.mxu1 }
 0x2b5   :  { %v1481_v51 = vmax.f32 %v1411_v36, 0.0 }
 0x2b6   :  { %v1415_v52 = vpop.f32.mrf.mxu1 }
 0x2b7   :  { %v1416_v53 = vadd.f32 %v2790_v16, %v1415_v52  ;;  %1529 = vxpose.xlu1.b32.cont [7/16] %v1481_v51, 128 }
 0x2b8   :  { %v1417_v54 = vpop.f32.mrf.mxu1 }
 0x2b9   :  { %v1482_v55 = vmax.f32 %v1416_v53, 0.0 }
 0x2ba   :  { %v1420_v57 = vpop.f32.mrf.mxu1 }
 0x2bb   :  { %v1421_v58 = vadd.f32 %v2790_v16, %v1420_v57  ;;  %1530 = vxpose.xlu1.b32.cont [8/16] %v1482_v55, 128 }
 0x2bc   :  { %v1422_v59 = vpop.f32.mrf.mxu1 }
 0x2bd   :  { %v1483_v60 = vmax.f32 %v1421_v58, 0.0  ;;  %v1725_v59 = vld [vmem:[#allocation2] sm:$0x1] }
 0x2be   :  { %v1425_v61 = vpop.f32.mrf.mxu1 }
 0x2bf   :  { %v1426_v62 = vadd.f32 %v2790_v16, %v1425_v61  ;;  %1531 = vxpose.xlu1.b32.cont [9/16] %v1483_v60, 128 }
 0x2c0   :  { %v1427_v0 = vpop.f32.mrf.mxu1 }
 0x2c1   :  { %v1484_v1 = vmax.f32 %v1426_v62, 0.0 }
 0x2c2   :  { %v1430_v3 = vpop.f32.mrf.mxu1 }
 0x2c3   :  { %v1431_v4 = vadd.f32 %v2790_v16, %v1430_v3  ;;  %1532 = vxpose.xlu1.b32.cont [10/16] %v1484_v1, 128 }
 0x2c4   :  { %v1432_v5 = vpop.f32.mrf.mxu1  ;;  %1648 = vperm.xlu0 %2015, %v1570_v2  }
 0x2c5   :  { %v1485_v6 = vmax.f32 %v1431_v4, 0.0 }
 0x2c6   :  { %v1435_v8 = vpop.f32.mrf.mxu1 }
 0x2c7   :  { %v1436_v9 = vadd.f32 %v2790_v16, %v1435_v8  ;;  %1533 = vxpose.xlu1.b32.cont [11/16] %v1485_v6, 128 }
 0x2c8   :  { %v1437_v10 = vpop.f32.mrf.mxu1 }
 0x2c9   :  { %v1486_v11 = vmax.f32 %v1436_v9, 0.0 }
 0x2ca   :  { %v1440_v12 = vpop.f32.mrf.mxu1 }
 0x2cb   :  { %v1441_v14 = vadd.f32 %v2790_v16, %v1440_v12  ;;  %1534 = vxpose.xlu1.b32.cont [12/16] %v1486_v11, 128 }
 0x2cc   :  { %v1442_v15 = vpop.f32.mrf.mxu1 }
 0x2cd   :  { %v1487_v17 = vmax.f32 %v1441_v14, 0.0 }
 0x2ce   :  { %v1445_v18 = vpop.f32.mrf.mxu1 }
 0x2cf   :  { %v1446_v19 = vadd.f32 %v2790_v16, %v1445_v18  ;;  %1535 = vxpose.xlu1.b32.cont [13/16] %v1487_v17, 128 }
 0x2d0   :  { %v1447_v20 = vpop.f32.mrf.mxu1 }
 0x2d1   :  { %v1488_v21 = vmax.f32 %v1446_v19, 0.0 }
 0x2d2   :  { %v1450_v49 = vpop.f32.mrf.mxu1 }
 0x2d3   :  { %v1451_v22 = vadd.f32 %v2790_v16, %v1450_v49  ;;  %1536 = vxpose.xlu1.b32.cont [14/16] %v1488_v21, 128 }
 0x2d4   :  { %v1452_v23 = vpop.f32.mrf.mxu1 }
 0x2d5   :  { %v1489_v24 = vmax.f32 %v1451_v22, 0.0 }
 0x2d6   :  { %v1455_v25 = vpop.f32.mrf.mxu1 }
 0x2d7   :  { %v1456_v27 = vadd.f32 %v2790_v16, %v1455_v25  ;;  %1537 = vxpose.xlu1.b32.cont [15/16] %v1489_v24, 128  ;;  %v1594_v16 = vpop.permute.xlu1 %1593 }
 0x2d8   :  { %v1457_v28 = vpop.f32.mrf.mxu1 }
 0x2d9   :  { %v1490_v30 = vmax.f32 %v1456_v27, 0.0 }
 0x2db   :  { %1538 = vxpose.xlu1.b32.end [16/16] %v1490_v30, 128  ;;  %v1507_v31 = vpop.trf.xlu0  ;;  %v1604_v55 = vpop.permute.xlu1 %1603 }
 0x2dc   :  { %v1651_v37 = vmul.f32 %v2816_v56, %v1507_v31 }
 0x2df   :  { %v1508_v33 = vpop.trf.xlu0  ;;  %v1614_v1 = vpop.permute.xlu1 %1613 }
 0x2e0   :  { %v1653_v34 = vmul.f32 %v1579_v29, %v1508_v33 }
 0x2e2   :  { %v1683_v40 = vadd.f32 %v1653_v34, %v1651_v37 }
 0x2e3   :  { %v1509_v35 = vpop.trf.xlu0  ;;  %v1624_v9 = vpop.permute.xlu1 %1623 }
 0x2e4   :  { %v1655_v38 = vmul.f32 %v1584_v32, %v1509_v35 }
 0x2e6   :  { %v1684_v42 = vadd.f32 %v1683_v40, %v1655_v38 }
 0x2e7   :  { %v1510_v41 = vpop.trf.xlu0  ;;  %v1634_v18 = vpop.permute.xlu1 %1633 }
 0x2e8   :  { %v1657_v47 = vmul.f32 %v1589_v39, %v1510_v41 }
 0x2ea   :  { %v1685_v48 = vadd.f32 %v1684_v42, %v1657_v47 }
 0x2eb   :  { %v1511_v36 = vpop.trf.xlu0  ;;  %v1644_v24 = vpop.permute.xlu1 %1643 }
 0x2ec   :  { %v1659_v50 = vmul.f32 %v1594_v16, %v1511_v36 }
 0x2ee   :  { %v1686_v52 = vadd.f32 %v1685_v48, %v1659_v50 }
 0x2ef   :  { %v1512_v51 = vpop.trf.xlu0 }
 0x2f0   :  { %v1661_v53 = vmul.f32 %v2820_v63, %v1512_v51 }
 0x2f2   :  { %v1687_v54 = vadd.f32 %v1686_v52, %v1661_v53 }
 0x2f3   :  { %v1513_v57 = vpop.trf.xlu0 }
 0x2f4   :  { %v1663_v58 = vmul.f32 %v1604_v55, %v1513_v57 }
 0x2f6   :  { %v1688_v61 = vadd.f32 %v1687_v54, %v1663_v58 }
 0x2f7   :  { %v1514_v60 = vpop.trf.xlu0 }
 0x2f8   :  { %v1665_v62 = vmul.f32 %v2826_v7, %v1514_v60 }
 0x2f9   :  { %1728 = vperm.xlu1 %2016, %v1725_v59  }
 0x2fa   :  { %v1689_v0 = vadd.f32 %v1688_v61, %v1665_v62 }
 0x2fb   :  { %v1515_v2 = vpop.trf.xlu0 }
 0x2fc   :  { %v1667_v3 = vmul.f32 %v1614_v1, %v1515_v2 }
 0x2fe   :  { %v1690_v5 = vadd.f32 %v1689_v0, %v1667_v3 }
 0x2ff   :  { %v1516_v4 = vpop.trf.xlu0 }
 0x300   :  { %v1669_v6 = vmul.f32 %v2829_v13, %v1516_v4 }
 0x302   :  { %v1691_v8 = vadd.f32 %v1690_v5, %v1669_v6 }
 0x303   :  { %v1517_v10 = vpop.trf.xlu0 }
 0x304   :  { %v1671_v11 = vmul.f32 %v1624_v9, %v1517_v10 }
 0x306   :  { %v1692_v14 = vadd.f32 %v1691_v8, %v1671_v11 }
 0x307   :  { %v1518_v12 = vpop.trf.xlu0 }
 0x308   :  { %v1673_v15 = vmul.f32 %v2833_v44, %v1518_v12 }
 0x30a   :  { %v1693_v17 = vadd.f32 %v1692_v14, %v1673_v15 }
 0x30b   :  { %v1519_v19 = vpop.trf.xlu0 }
 0x30c   :  { %v1675_v20 = vmul.f32 %v1634_v18, %v1519_v19 }
 0x30e   :  { %v1694_v49 = vadd.f32 %v1693_v17, %v1675_v20 }
 0x30f   :  { %v1520_v21 = vpop.trf.xlu0 }
 0x310   :  { %v1677_v22 = vmul.f32 %v2836_v26, %v1520_v21 }
 0x312   :  { %v1695_v23 = vadd.f32 %v1694_v49, %v1677_v22 }
 0x313   :  { %v1521_v3 = vpop.trf.xlu0 }
 0x31b   :  { %v1539_v25 = vpop.trf.xlu1 }
 0x31c   :  { %v1652_v31 = vmul.f32 %v2816_v56, %v1539_v25 }
 0x31f   :  { %v1540_v27 = vpop.trf.xlu1 }
 0x320   :  { %v1654_v28 = vmul.f32 %v1579_v29, %v1540_v27 }
 0x322   :  { %v1704_v34 = vadd.f32 %v1654_v28, %v1652_v31 }
 0x323   :  { %v1541_v30 = vpop.trf.xlu1 }
 0x324   :  { %v1656_v33 = vmul.f32 %v1584_v32, %v1541_v30  ;;  %v2041_v30 = vmov 1966171168  }
 0x325   :  { %v1741_v31 = vunpack.c.l.s4 %v2041_v30 }
 0x326   :  { %v1705_v37 = vadd.f32 %v1704_v34, %v1656_v33 }
 0x327   :  { %v1542_v35 = vpop.trf.xlu1 }
 0x328   :  { %v1658_v38 = vmul.f32 %v1589_v39, %v1542_v35 }
 0x32a   :  { %v1706_v40 = vadd.f32 %v1705_v37, %v1658_v38 }
 0x32b   :  { %v1543_v41 = vpop.trf.xlu1 }
 0x32c   :  { %v1660_v42 = vmul.f32 %v1594_v16, %v1543_v41 }
 0x32e   :  { %v1707_v48 = vadd.f32 %v1706_v40, %v1660_v42 }
 0x32f   :  { %v1544_v47 = vpop.trf.xlu1 }
 0x330   :  { %v1662_v36 = vmul.f32 %v2820_v63, %v1544_v47 }
 0x332   :  { %v1708_v50 = vadd.f32 %v1707_v48, %v1662_v36 }
 0x333   :  { %v1545_v51 = vpop.trf.xlu1 }
 0x334   :  { %v1664_v52 = vmul.f32 %v1604_v55, %v1545_v51 }
 0x336   :  { %v1709_v29 = vadd.f32 %v1708_v50, %v1664_v52 }
 0x337   :  { %v1546_v53 = vpop.trf.xlu1 }
 0x338   :  { %v1666_v54 = vmul.f32 %v2826_v7, %v1546_v53  ;;  %v1522_v7 = vpop.trf.xlu0 }
 0x33a   :  { %v1710_v56 = vadd.f32 %v1709_v29, %v1666_v54 }
 0x33b   :  { %v1547_v32 = vpop.trf.xlu1 }
 0x33c   :  { %v1668_v57 = vmul.f32 %v1614_v1, %v1547_v32 }
 0x33e   :  { %v1711_v59 = vadd.f32 %v1710_v56, %v1668_v57 }
 0x33f   :  { %v1548_v58 = vpop.trf.xlu1  ;;  %v1649_v11 = vpop.permute.xlu0 %1648 }
 0x340   :  { %v1670_v39 = vmul.f32 %v2829_v13, %v1548_v58  ;;  %v1679_v13 = vmul.f32 %v1644_v24, %v1521_v3 }
 0x342   :  { %v1712_v60 = vadd.f32 %v1711_v59, %v1670_v39  ;;  %v1696_v17 = vadd.f32 %v1695_v23, %v1679_v13 }
 0x343   :  { %v1549_v16 = vpop.trf.xlu1 }
 0x344   :  { %v1672_v61 = vmul.f32 %v1624_v9, %v1549_v16  ;;  %v1681_v9 = vmul.f32 %v1649_v11, %v1522_v7 }
 0x346   :  { %v1713_v0 = vadd.f32 %v1712_v60, %v1672_v61 }
 0x347   :  { %v1550_v62 = vpop.trf.xlu1 }
 0x348   :  { %v1674_v63 = vmul.f32 %v2833_v44, %v1550_v62  ;;  %v1697_v44 = vadd.f32 %v1696_v17, %v1681_v9 }
 0x34a   :  { %v1714_v2 = vadd.f32 %v1713_v0, %v1674_v63  ;;  %v1698_v21 = vrot.slane %v1697_v44, 4 }
 0x34b   :  { %v1551_v55 = vpop.trf.xlu1 }
 0x34c   :  { %v1676_v4 = vmul.f32 %v1634_v18, %v1551_v55  ;;  %v1699_v18 = vadd.f32 %v1698_v21, %v1697_v44 }
 0x34e   :  { %v1715_v6 = vadd.f32 %v1714_v2, %v1676_v4  ;;  %v1700_v25 = vrot.slane %v1699_v18, 2 }
 0x34f   :  { %v1552_v5 = vpop.trf.xlu1 }
 0x350   :  { %v1678_v1 = vmul.f32 %v2836_v26, %v1552_v5  ;;  %v1701_v28 = vadd.f32 %v1700_v25, %v1699_v18 }
 0x352   :  { %v1716_v8 = vadd.f32 %v1715_v6, %v1678_v1  ;;  %v1702_v33 = vrot.slane %v1701_v28, 1 }
 0x353   :  { %v1553_v10 = vpop.trf.xlu1 }
 0x354   :  { %v1680_v12 = vmul.f32 %v1644_v24, %v1553_v10  ;;  %v1742_v24 = vunpack.c.0.s8 %v1741_v31  ;;  %v1703_v37 = vadd.f32 %v1702_v33, %v1701_v28 }
 0x356   :  { %v1717_v19 = vadd.f32 %v1716_v8, %v1680_v12  ;;  %v1745_v42 = vsub.s32 %v1742_v24, %v2665_v45 }
 0x357   :  { %v1554_v14 = vpop.trf.xlu1 }
 0x358   :  { %v1682_v15 = vmul.f32 %v1649_v11, %v1554_v14 }
 0x35a   :  { %v1718_v20 = vadd.f32 %v1717_v19, %v1682_v15 }
 0x35c   :  { %v1719_v49 = vrot.slane %v1718_v20, 4 }
 0x35e   :  { %v1720_v22 = vadd.f32 %v1719_v49, %v1718_v20 }
 0x360   :  { %v1721_v27 = vrot.slane %v1720_v22, 2 }
 0x362   :  { %v1722_v26 = vadd.f32 %v1721_v27, %v1720_v22 }
 0x364   :  { %v1723_v34 = vrot.slane %v1722_v26, 1 }
 0x366   :  { %v1724_v38 = vadd.f32 %v1723_v34, %v1722_v26 }
 0x374   :  { %v1729_v35 = vpop.permute.xlu1 %1728 }
 0x375   :  { %v1734_v23 = vrot.slane %v1729_v35, %v866_v46 }
 0x377   :  { %v1735_v40 = vadd.f32 %v1734_v23, %v1703_v37  ;;  %v1736_v41 = vadd.f32 %v1734_v23, %v1724_v38 }
 0x379   :  { %v1739_v47 = vcombine.low %v1735_v40, %v1736_v41 }
 0x37b   :  { %v1746_v48 = vrot.slane %v1739_v47, %v1745_v42 }
 0x37d   :  { %v1753_v36 = vrot.slane %v1746_v48, %v1745_v42 }
 0x37f   :  { %1759 = vst.msk [vmem:[#allocation3] sm:$0x3] %vm1757_vm3, %v1753_v36 }
 0x380   :  { %2028 = shalt.err (!%p2025_p4)
}
 0x381   :  { %1769 = dma.vmem_to_hbm [thread:$0]  %s1767_s13, 32, %s2869_s11, [#allocation4]  }
 0x382   :  { %2037 = dma.done.wait [#allocation4], 32  }
 0x383   :  { %2038 = vsyncadd [#allocation4], 4294967264 }
 0x384   :  { %1773 = vsyncpa [#allocation4], 1 }

</bundles_post_ra>
